<compile_context>
chip_gen: v7x
topology: tpu7x:2x2x1
jax: 0.10.0
libtpu: 0.0.40
codegen_flags: <defaults>
</compile_context>

<pallas_src>
import jax
import jax.numpy as jnp
import numpy as np
from jax import lax
from jax.experimental import pallas as pl
from jax.experimental.pallas import tpu as pltpu

EPS = 1e-5      # nn.BatchNorm2d default
LANES = 128


def _pick_row_tile(H, W):
    """Largest row-tile <= 8 that divides H and keeps the out-block sublane dim %8==0."""
    cap = max(1, min(8, 4096 // (W + 2)))
    for th in range(cap, 0, -1):
        if H % th == 0 and (th * (W + 2)) % 8 == 0:
            return th
    return H   # single full-height tile (block == full dim is always legal)


def _input_conv_block_impl(x_nchw, conv_w, conv_b, gamma, beta):
    """x: (N,Cin,H,W); conv_w: (Cout,Cin,3,3) OIHW; conv_b/gamma/beta: (Cout,)."""
    del conv_b  # exact: the conv bias cancels in training-mode BN (y - mean(y))

    N, Cin, H, W = x_nchw.shape
    Cout = conv_w.shape[0]
    Cpad = ((Cout + LANES - 1) // LANES) * LANES          # lane-dense channel pad
    th = _pick_row_tile(H, W)                             # image rows per tile
    nt = H // th
    Wp = W + 2                                            # padded row width
    m2 = th * Wp                                          # conv outputs per tile (incl. 2 junk cols/row)
    m2_in = (th + 2) * Wp + 2                             # tile input rows (halo + 2 spill rows)

    # ---- glue: NCHW -> NHWC, zero-pad, halo-replicated row slabs, flatten (h,w) ----
    x_nhwc = jnp.transpose(x_nchw, (0, 2, 3, 1)).astype(jnp.float32)
    x_pad = jnp.pad(x_nhwc, ((0, 0), (1, 1), (1, 1), (0, 0)))
    slabs = [x_pad[:, i * th:i * th + th + 2] for i in range(nt)]       # (N, th+2, Wp, Cin)
    x_tiles = jnp.stack(slabs, axis=1).reshape(N, nt, (th + 2) * Wp, Cin)
    x_tiles = jnp.pad(x_tiles, ((0, 0), (0, 0), (0, 2), (0, 0)))        # 2 spill rows

    # Weight matrix: row (ky*3+kx)*Cin + ci  ==  conv_w[:, ci, ky, kx], lane-padded.
    w_mat = jnp.transpose(conv_w, (2, 3, 1, 0)).reshape(9 * Cin, Cout).astype(jnp.float32)
    w_mat = jnp.pad(w_mat, ((0, 0), (0, Cpad - Cout)))

    # Validity mask along the flattened (row, col) axis: drop the 2 junk columns per row.
    col = np.arange(m2) % Wp
    mask = jnp.asarray((col < W).astype(np.float32)).reshape(m2, 1)

    offs = tuple(ky * Wp + kx for ky in range(3) for kx in range(3))

    def conv_tile(x_ref, w_ref):
        # 3x3 conv of one row-tile as 9 shifted-slice matmuls -> (m2, Cpad) f32.
        y = jnp.zeros((m2, Cpad), jnp.float32)
        for t, off in enumerate(offs):
            y = y + jnp.dot(x_ref[off:off + m2, :],
                            w_ref[t * Cin:(t + 1) * Cin, :],
                            preferred_element_type=jnp.float32)
        return y

    # ------------------- pass 1: per-tile channel sum / sum-of-squares -------------------
    def stats_kernel(x_ref, w_ref, m_ref, s_ref):
        y = conv_tile(x_ref, w_ref)
        m = m_ref[...]                                    # (m2, 1) {0,1}
        s_ref[0:1, :] = jnp.sum(y * m, axis=0, keepdims=True)
        s_ref[1:2, :] = jnp.sum(y * y * m, axis=0, keepdims=True)

    grid = (N, nt)
    x_spec = pl.BlockSpec((None, None, m2_in, Cin), lambda n, i: (n, i, 0, 0))
    w_spec = pl.BlockSpec((9 * Cin, Cpad), lambda n, i: (0, 0))
    mask_spec = pl.BlockSpec((m2, 1), lambda n, i: (0, 0))
    vec_spec = pl.BlockSpec((1, Cpad), lambda n, i: (0, 0))
    cparams = pltpu.CompilerParams(
        dimension_semantics=("parallel", "parallel"),
        vmem_limit_bytes=32 * 1024 * 1024)
    flops = 2 * N * nt * m2 * 9 * Cin * Cpad
    x_bytes = int(np.prod(x_tiles.shape)) * 4
    w_bytes = int(np.prod(w_mat.shape)) * 4

    stats = pl.pallas_call(
        stats_kernel,
        out_shape=jax.ShapeDtypeStruct((N, nt, 2, Cpad), jnp.float32),
        grid=grid,
        in_specs=[x_spec, w_spec, mask_spec],
        out_specs=pl.BlockSpec((None, None, 2, Cpad), lambda n, i: (n, i, 0, 0)),
        compiler_params=cparams,
        cost_estimate=pl.CostEstimate(
            flops=flops, transcendentals=0,
            bytes_accessed=x_bytes + w_bytes + N * nt * 2 * Cpad * 4),
    )(x_tiles, w_mat, mask)

    # ------------- glue: fold training-mode BN into per-channel scale / shift -------------
    count = float(N * H * W)
    s = jnp.sum(stats, axis=(0, 1))                       # (2, Cpad)
    mean = s[0] / count
    var = jnp.maximum(s[1] / count - mean * mean, 0.0)
    gamma_p = jnp.pad(gamma.astype(jnp.float32), (0, Cpad - Cout))
    beta_p = jnp.pad(beta.astype(jnp.float32), (0, Cpad - Cout))
    scale = (gamma_p * lax.rsqrt(var + EPS)).reshape(1, Cpad)
    shift = beta_p.reshape(1, Cpad) - mean.reshape(1, Cpad) * scale

    # ------------------- pass 2: recompute conv, normalize, ReLU -------------------
    def norm_kernel(x_ref, w_ref, sc_ref, sh_ref, o_ref):
        y = conv_tile(x_ref, w_ref)
        o_ref[...] = jnp.maximum(y * sc_ref[...] + sh_ref[...], 0.0)

    out = pl.pallas_call(
        norm_kernel,
        out_shape=jax.ShapeDtypeStruct((N, nt, m2, Cpad), jnp.float32),
        grid=grid,
        in_specs=[x_spec, w_spec, vec_spec, vec_spec],
        out_specs=pl.BlockSpec((None, None, m2, Cpad), lambda n, i: (n, i, 0, 0)),
        compiler_params=cparams,
        cost_estimate=pl.CostEstimate(
            flops=flops, transcendentals=0,
            bytes_accessed=x_bytes + w_bytes + N * nt * m2 * Cpad * 4),
    )(x_tiles, w_mat, scale, shift)

    # ---- glue: drop junk columns / channel pad, back to NCHW ----
    out = out.reshape(N, H, Wp, Cpad)[:, :, :W, :Cout]
    return jnp.transpose(out, (0, 3, 1, 2))


input_conv_block = jax.jit(_input_conv_block_impl)


def _reference(x_nchw, conv_w, conv_b, gamma, beta):
    y = lax.conv_general_dilated(
        x_nchw, conv_w, window_strides=(1, 1), padding="SAME",
        dimension_numbers=("NCHW", "OIHW", "NCHW"))
    y = y + conv_b.reshape(1, -1, 1, 1)
    mean = jnp.mean(y, axis=(0, 2, 3), keepdims=True)
    var = jnp.mean((y - mean) ** 2, axis=(0, 2, 3), keepdims=True)
    y = (y - mean) * lax.rsqrt(var + EPS)
    y = y * gamma.reshape(1, -1, 1, 1) + beta.reshape(1, -1, 1, 1)
    return jnp.maximum(y, 0.0)


if __name__ == "__main__":
    N, Cin, Cout, H, W = 2, 4, 8, 16, 16

    key = jax.random.PRNGKey(0)
    kx, kw, kb, kg, kbeta = jax.random.split(key, 5)

    x = jax.random.normal(kx, (N, Cin, H, W), dtype=jnp.float32)
    conv_w = jax.random.normal(kw, (Cout, Cin, 3, 3), dtype=jnp.float32) * 0.1
    conv_b = jax.random.normal(kb, (Cout,), dtype=jnp.float32) * 0.1
    gamma = 1.0 + 0.1 * jax.random.normal(kg, (Cout,), dtype=jnp.float32)
    beta = 0.1 * jax.random.normal(kbeta, (Cout,), dtype=jnp.float32)

    out = input_conv_block(x, conv_w, conv_b, gamma, beta)
    jax.block_until_ready(out)

    ref = _reference(x, conv_w, conv_b, gamma, beta)
    np.testing.assert_allclose(np.asarray(out), np.asarray(ref), rtol=1e-4, atol=1e-4)

    print("KERNEL_OK")
</pallas_src>

<mosaic_0001>
module attributes {stable_mosaic.version = 11 : i64} {
  func.func @stats_kernel(%arg0: i32, %arg1: i32, %arg2: memref<1x1x182x4xf32, #tpu.memory_space<vmem>>, %arg3: memref<36x128xf32, #tpu.memory_space<vmem>>, %arg4: memref<144x1xf32, #tpu.memory_space<vmem>>, %arg5: memref<1x1x2x128xf32, #tpu.memory_space<vmem>>) attributes {dimension_semantics = [#tpu.dimension_semantics<parallel>, #tpu.dimension_semantics<parallel>], iteration_bounds = array<i64: 2, 2>, scalar_prefetch = 0 : i64, scratch_operands = 0 : i64, tpu.core_type = #tpu.core_type<tc>, window_params = [{transform_indices = @transform_0, window_bounds = array<i64: 1, 1, 182, 4>}, {pipeline_mode = #tpu.pipeline_mode<synchronous>, transform_indices = @transform_1, window_bounds = array<i64: 36, 128>}, {pipeline_mode = #tpu.pipeline_mode<synchronous>, transform_indices = @transform_2, window_bounds = array<i64: 144, 1>}, {transform_indices = @transform_3, window_bounds = array<i64: 1, 1, 2, 128>}]} {
    %cst = arith.constant 0.000000e+00 : f32
    %0 = vector.broadcast %cst : f32 to vector<144x128xf32>
    %c0 = arith.constant 0 : index
    %c0_0 = arith.constant 0 : index
    %c0_1 = arith.constant 0 : index
    %c0_2 = arith.constant 0 : index
    %1 = vector.load %arg2[%c0, %c0_0, %c0_1, %c0_2] : memref<1x1x182x4xf32, #tpu.memory_space<vmem>>, vector<1x1x144x4xf32>
    %2 = vector.shape_cast %1 : vector<1x1x144x4xf32> to vector<144x4xf32>
    %c0_3 = arith.constant 0 : index
    %c0_4 = arith.constant 0 : index
    %3 = vector.load %arg3[%c0_3, %c0_4] : memref<36x128xf32, #tpu.memory_space<vmem>>, vector<4x128xf32>
    %cst_5 = arith.constant dense<0.000000e+00> : vector<144x128xf32>
    %4 = tpu.matmul %2, %3, %cst_5 {dimension_numbers = #tpu.dot_dimension_numbers<[1], [0], [0], [1], [0, 0, 1, 1], [], []>} : vector<144x4xf32>, vector<4x128xf32>, vector<144x128xf32> -> vector<144x128xf32>
    %5 = arith.addf %0, %4 : vector<144x128xf32>
    %c0_6 = arith.constant 0 : index
    %c0_7 = arith.constant 0 : index
    %c1 = arith.constant 1 : index
    %c0_8 = arith.constant 0 : index
    %6 = vector.load %arg2[%c0_6, %c0_7, %c1, %c0_8] : memref<1x1x182x4xf32, #tpu.memory_space<vmem>>, vector<1x1x144x4xf32>
    %7 = vector.shape_cast %6 : vector<1x1x144x4xf32> to vector<144x4xf32>
    %c4 = arith.constant 4 : index
    %c0_9 = arith.constant 0 : index
    %8 = vector.load %arg3[%c4, %c0_9] : memref<36x128xf32, #tpu.memory_space<vmem>>, vector<4x128xf32>
    %cst_10 = arith.constant dense<0.000000e+00> : vector<144x128xf32>
    %9 = tpu.matmul %7, %8, %cst_10 {dimension_numbers = #tpu.dot_dimension_numbers<[1], [0], [0], [1], [0, 0, 1, 1], [], []>} : vector<144x4xf32>, vector<4x128xf32>, vector<144x128xf32> -> vector<144x128xf32>
    %10 = arith.addf %5, %9 : vector<144x128xf32>
    %c0_11 = arith.constant 0 : index
    %c0_12 = arith.constant 0 : index
    %c2 = arith.constant 2 : index
    %c0_13 = arith.constant 0 : index
    %11 = vector.load %arg2[%c0_11, %c0_12, %c2, %c0_13] : memref<1x1x182x4xf32, #tpu.memory_space<vmem>>, vector<1x1x144x4xf32>
    %12 = vector.shape_cast %11 : vector<1x1x144x4xf32> to vector<144x4xf32>
    %c8 = arith.constant 8 : index
    %c0_14 = arith.constant 0 : index
    %13 = vector.load %arg3[%c8, %c0_14] : memref<36x128xf32, #tpu.memory_space<vmem>>, vector<4x128xf32>
    %cst_15 = arith.constant dense<0.000000e+00> : vector<144x128xf32>
    %14 = tpu.matmul %12, %13, %cst_15 {dimension_numbers = #tpu.dot_dimension_numbers<[1], [0], [0], [1], [0, 0, 1, 1], [], []>} : vector<144x4xf32>, vector<4x128xf32>, vector<144x128xf32> -> vector<144x128xf32>
    %15 = arith.addf %10, %14 : vector<144x128xf32>
    %c0_16 = arith.constant 0 : index
    %c0_17 = arith.constant 0 : index
    %c18 = arith.constant 18 : index
    %c0_18 = arith.constant 0 : index
    %16 = vector.load %arg2[%c0_16, %c0_17, %c18, %c0_18] : memref<1x1x182x4xf32, #tpu.memory_space<vmem>>, vector<1x1x144x4xf32>
    %17 = vector.shape_cast %16 : vector<1x1x144x4xf32> to vector<144x4xf32>
    %c12 = arith.constant 12 : index
    %c0_19 = arith.constant 0 : index
    %18 = vector.load %arg3[%c12, %c0_19] : memref<36x128xf32, #tpu.memory_space<vmem>>, vector<4x128xf32>
    %cst_20 = arith.constant dense<0.000000e+00> : vector<144x128xf32>
    %19 = tpu.matmul %17, %18, %cst_20 {dimension_numbers = #tpu.dot_dimension_numbers<[1], [0], [0], [1], [0, 0, 1, 1], [], []>} : vector<144x4xf32>, vector<4x128xf32>, vector<144x128xf32> -> vector<144x128xf32>
    %20 = arith.addf %15, %19 : vector<144x128xf32>
    %c0_21 = arith.constant 0 : index
    %c0_22 = arith.constant 0 : index
    %c19 = arith.constant 19 : index
    %c0_23 = arith.constant 0 : index
    %21 = vector.load %arg2[%c0_21, %c0_22, %c19, %c0_23] : memref<1x1x182x4xf32, #tpu.memory_space<vmem>>, vector<1x1x144x4xf32>
    %22 = vector.shape_cast %21 : vector<1x1x144x4xf32> to vector<144x4xf32>
    %c16 = arith.constant 16 : index
    %c0_24 = arith.constant 0 : index
    %23 = vector.load %arg3[%c16, %c0_24] : memref<36x128xf32, #tpu.memory_space<vmem>>, vector<4x128xf32>
    %cst_25 = arith.constant dense<0.000000e+00> : vector<144x128xf32>
    %24 = tpu.matmul %22, %23, %cst_25 {dimension_numbers = #tpu.dot_dimension_numbers<[1], [0], [0], [1], [0, 0, 1, 1], [], []>} : vector<144x4xf32>, vector<4x128xf32>, vector<144x128xf32> -> vector<144x128xf32>
    %25 = arith.addf %20, %24 : vector<144x128xf32>
    %c0_26 = arith.constant 0 : index
    %c0_27 = arith.constant 0 : index
    %c20 = arith.constant 20 : index
    %c0_28 = arith.constant 0 : index
    %26 = vector.load %arg2[%c0_26, %c0_27, %c20, %c0_28] : memref<1x1x182x4xf32, #tpu.memory_space<vmem>>, vector<1x1x144x4xf32>
    %27 = vector.shape_cast %26 : vector<1x1x144x4xf32> to vector<144x4xf32>
    %c20_29 = arith.constant 20 : index
    %c0_30 = arith.constant 0 : index
    %28 = vector.load %arg3[%c20_29, %c0_30] : memref<36x128xf32, #tpu.memory_space<vmem>>, vector<4x128xf32>
    %cst_31 = arith.constant dense<0.000000e+00> : vector<144x128xf32>
    %29 = tpu.matmul %27, %28, %cst_31 {dimension_numbers = #tpu.dot_dimension_numbers<[1], [0], [0], [1], [0, 0, 1, 1], [], []>} : vector<144x4xf32>, vector<4x128xf32>, vector<144x128xf32> -> vector<144x128xf32>
    %30 = arith.addf %25, %29 : vector<144x128xf32>
    %c0_32 = arith.constant 0 : index
    %c0_33 = arith.constant 0 : index
    %c36 = arith.constant 36 : index
    %c0_34 = arith.constant 0 : index
    %31 = vector.load %arg2[%c0_32, %c0_33, %c36, %c0_34] : memref<1x1x182x4xf32, #tpu.memory_space<vmem>>, vector<1x1x144x4xf32>
    %32 = vector.shape_cast %31 : vector<1x1x144x4xf32> to vector<144x4xf32>
    %c24 = arith.constant 24 : index
    %c0_35 = arith.constant 0 : index
    %33 = vector.load %arg3[%c24, %c0_35] : memref<36x128xf32, #tpu.memory_space<vmem>>, vector<4x128xf32>
    %cst_36 = arith.constant dense<0.000000e+00> : vector<144x128xf32>
    %34 = tpu.matmul %32, %33, %cst_36 {dimension_numbers = #tpu.dot_dimension_numbers<[1], [0], [0], [1], [0, 0, 1, 1], [], []>} : vector<144x4xf32>, vector<4x128xf32>, vector<144x128xf32> -> vector<144x128xf32>
    %35 = arith.addf %30, %34 : vector<144x128xf32>
    %c0_37 = arith.constant 0 : index
    %c0_38 = arith.constant 0 : index
    %c37 = arith.constant 37 : index
    %c0_39 = arith.constant 0 : index
    %36 = vector.load %arg2[%c0_37, %c0_38, %c37, %c0_39] : memref<1x1x182x4xf32, #tpu.memory_space<vmem>>, vector<1x1x144x4xf32>
    %37 = vector.shape_cast %36 : vector<1x1x144x4xf32> to vector<144x4xf32>
    %c28 = arith.constant 28 : index
    %c0_40 = arith.constant 0 : index
    %38 = vector.load %arg3[%c28, %c0_40] : memref<36x128xf32, #tpu.memory_space<vmem>>, vector<4x128xf32>
    %cst_41 = arith.constant dense<0.000000e+00> : vector<144x128xf32>
    %39 = tpu.matmul %37, %38, %cst_41 {dimension_numbers = #tpu.dot_dimension_numbers<[1], [0], [0], [1], [0, 0, 1, 1], [], []>} : vector<144x4xf32>, vector<4x128xf32>, vector<144x128xf32> -> vector<144x128xf32>
    %40 = arith.addf %35, %39 : vector<144x128xf32>
    %c0_42 = arith.constant 0 : index
    %c0_43 = arith.constant 0 : index
    %c38 = arith.constant 38 : index
    %c0_44 = arith.constant 0 : index
    %41 = vector.load %arg2[%c0_42, %c0_43, %c38, %c0_44] : memref<1x1x182x4xf32, #tpu.memory_space<vmem>>, vector<1x1x144x4xf32>
    %42 = vector.shape_cast %41 : vector<1x1x144x4xf32> to vector<144x4xf32>
    %c32 = arith.constant 32 : index
    %c0_45 = arith.constant 0 : index
    %43 = vector.load %arg3[%c32, %c0_45] : memref<36x128xf32, #tpu.memory_space<vmem>>, vector<4x128xf32>
    %cst_46 = arith.constant dense<0.000000e+00> : vector<144x128xf32>
    %44 = tpu.matmul %42, %43, %cst_46 {dimension_numbers = #tpu.dot_dimension_numbers<[1], [0], [0], [1], [0, 0, 1, 1], [], []>} : vector<144x4xf32>, vector<4x128xf32>, vector<144x128xf32> -> vector<144x128xf32>
    %45 = arith.addf %40, %44 : vector<144x128xf32>
    %c0_47 = arith.constant 0 : index
    %c0_48 = arith.constant 0 : index
    %46 = vector.load %arg4[%c0_47, %c0_48] : memref<144x1xf32, #tpu.memory_space<vmem>>, vector<144x1xf32>
    %47 = vector.broadcast %46 : vector<144x1xf32> to vector<144x128xf32>
    %48 = arith.mulf %45, %47 : vector<144x128xf32>
    %cst_49 = arith.constant dense<0.000000e+00> : vector<128xf32>
    %49 = vector.multi_reduction <add>, %48, %cst_49 [0] : vector<144x128xf32> to vector<128xf32>
    %50 = vector.shape_cast %49 : vector<128xf32> to vector<1x128xf32>
    %c0_50 = arith.constant 0 : index
    %c0_51 = arith.constant 0 : index
    %c0_52 = arith.constant 0 : index
    %c0_53 = arith.constant 0 : index
    %51 = vector.load %arg5[%c0_50, %c0_51, %c0_52, %c0_53] : memref<1x1x2x128xf32, #tpu.memory_space<vmem>>, vector<1x1x1x128xf32>
    %52 = vector.shape_cast %51 : vector<1x1x1x128xf32> to vector<1x128xf32>
    %53 = vector.shape_cast %50 : vector<1x128xf32> to vector<1x1x1x128xf32>
    tpu.vector_store %arg5[%c0_50, %c0_51, %c0_52, %c0_53], %53 {strides = array<i32>} : memref<1x1x2x128xf32, #tpu.memory_space<vmem>>, vector<1x1x1x128xf32>,
    %54 = arith.mulf %45, %45 : vector<144x128xf32>
    %55 = vector.broadcast %46 : vector<144x1xf32> to vector<144x128xf32>
    %56 = arith.mulf %54, %55 : vector<144x128xf32>
    %cst_54 = arith.constant dense<0.000000e+00> : vector<128xf32>
    %57 = vector.multi_reduction <add>, %56, %cst_54 [0] : vector<144x128xf32> to vector<128xf32>
    %58 = vector.shape_cast %57 : vector<128xf32> to vector<1x128xf32>
    %c0_55 = arith.constant 0 : index
    %c0_56 = arith.constant 0 : index
    %c1_57 = arith.constant 1 : index
    %c0_58 = arith.constant 0 : index
    %59 = vector.load %arg5[%c0_55, %c0_56, %c1_57, %c0_58] : memref<1x1x2x128xf32, #tpu.memory_space<vmem>>, vector<1x1x1x128xf32>
    %60 = vector.shape_cast %59 : vector<1x1x1x128xf32> to vector<1x128xf32>
    %61 = vector.shape_cast %58 : vector<1x128xf32> to vector<1x1x1x128xf32>
    tpu.vector_store %arg5[%c0_55, %c0_56, %c1_57, %c0_58], %61 {strides = array<i32>} : memref<1x1x2x128xf32, #tpu.memory_space<vmem>>, vector<1x1x1x128xf32>,
    return
  }
  func.func @transform_0(%arg0: i32, %arg1: i32) -> (i32, i32, i32, i32) {
    %c0_i32 = arith.constant 0 : i32
    %c0_i32_0 = arith.constant 0 : i32
    %c0_i32_1 = arith.constant 0 : i32
    return %arg0, %arg1, %c0_i32, %c0_i32_0 : i32, i32, i32, i32
  }
  func.func @transform_1(%arg0: i32, %arg1: i32) -> (i32, i32) {
    %c0_i32 = arith.constant 0 : i32
    %c0_i32_0 = arith.constant 0 : i32
    %c0_i32_1 = arith.constant 0 : i32
    return %c0_i32, %c0_i32_0 : i32, i32
  }
  func.func @transform_2(%arg0: i32, %arg1: i32) -> (i32, i32) {
    %c0_i32 = arith.constant 0 : i32
    %c0_i32_0 = arith.constant 0 : i32
    %c0_i32_1 = arith.constant 0 : i32
    return %c0_i32, %c0_i32_0 : i32, i32
  }
  func.func @transform_3(%arg0: i32, %arg1: i32) -> (i32, i32, i32, i32) {
    %c0_i32 = arith.constant 0 : i32
    %c0_i32_0 = arith.constant 0 : i32
    %c0_i32_1 = arith.constant 0 : i32
    return %arg0, %arg1, %c0_i32, %c0_i32_0 : i32, i32, i32, i32
  }
}

module attributes {stable_mosaic.version = 11 : i64} {
  func.func @norm_kernel(%arg0: i32, %arg1: i32, %arg2: memref<1x1x182x4xf32, #tpu.memory_space<vmem>>, %arg3: memref<36x128xf32, #tpu.memory_space<vmem>>, %arg4: memref<1x128xf32, #tpu.memory_space<vmem>>, %arg5: memref<1x128xf32, #tpu.memory_space<vmem>>, %arg6: memref<1x1x144x128xf32, #tpu.memory_space<vmem>>) attributes {dimension_semantics = [#tpu.dimension_semantics<parallel>, #tpu.dimension_semantics<parallel>], iteration_bounds = array<i64: 2, 2>, scalar_prefetch = 0 : i64, scratch_operands = 0 : i64, tpu.core_type = #tpu.core_type<tc>, window_params = [{transform_indices = @transform_0, window_bounds = array<i64: 1, 1, 182, 4>}, {pipeline_mode = #tpu.pipeline_mode<synchronous>, transform_indices = @transform_1, window_bounds = array<i64: 36, 128>}, {pipeline_mode = #tpu.pipeline_mode<synchronous>, transform_indices = @transform_2, window_bounds = array<i64: 1, 128>}, {pipeline_mode = #tpu.pipeline_mode<synchronous>, transform_indices = @transform_3, window_bounds = array<i64: 1, 128>}, {transform_indices = @transform_4, window_bounds = array<i64: 1, 1, 144, 128>}]} {
    %cst = arith.constant 0.000000e+00 : f32
    %0 = vector.broadcast %cst : f32 to vector<144x128xf32>
    %c0 = arith.constant 0 : index
    %c0_0 = arith.constant 0 : index
    %c0_1 = arith.constant 0 : index
    %c0_2 = arith.constant 0 : index
    %1 = vector.load %arg2[%c0, %c0_0, %c0_1, %c0_2] : memref<1x1x182x4xf32, #tpu.memory_space<vmem>>, vector<1x1x144x4xf32>
    %2 = vector.shape_cast %1 : vector<1x1x144x4xf32> to vector<144x4xf32>
    %c0_3 = arith.constant 0 : index
    %c0_4 = arith.constant 0 : index
    %3 = vector.load %arg3[%c0_3, %c0_4] : memref<36x128xf32, #tpu.memory_space<vmem>>, vector<4x128xf32>
    %cst_5 = arith.constant dense<0.000000e+00> : vector<144x128xf32>
    %4 = tpu.matmul %2, %3, %cst_5 {dimension_numbers = #tpu.dot_dimension_numbers<[1], [0], [0], [1], [0, 0, 1, 1], [], []>} : vector<144x4xf32>, vector<4x128xf32>, vector<144x128xf32> -> vector<144x128xf32>
    %5 = arith.addf %0, %4 : vector<144x128xf32>
    %c0_6 = arith.constant 0 : index
    %c0_7 = arith.constant 0 : index
    %c1 = arith.constant 1 : index
    %c0_8 = arith.constant 0 : index
    %6 = vector.load %arg2[%c0_6, %c0_7, %c1, %c0_8] : memref<1x1x182x4xf32, #tpu.memory_space<vmem>>, vector<1x1x144x4xf32>
    %7 = vector.shape_cast %6 : vector<1x1x144x4xf32> to vector<144x4xf32>
    %c4 = arith.constant 4 : index
    %c0_9 = arith.constant 0 : index
    %8 = vector.load %arg3[%c4, %c0_9] : memref<36x128xf32, #tpu.memory_space<vmem>>, vector<4x128xf32>
    %cst_10 = arith.constant dense<0.000000e+00> : vector<144x128xf32>
    %9 = tpu.matmul %7, %8, %cst_10 {dimension_numbers = #tpu.dot_dimension_numbers<[1], [0], [0], [1], [0, 0, 1, 1], [], []>} : vector<144x4xf32>, vector<4x128xf32>, vector<144x128xf32> -> vector<144x128xf32>
    %10 = arith.addf %5, %9 : vector<144x128xf32>
    %c0_11 = arith.constant 0 : index
    %c0_12 = arith.constant 0 : index
    %c2 = arith.constant 2 : index
    %c0_13 = arith.constant 0 : index
    %11 = vector.load %arg2[%c0_11, %c0_12, %c2, %c0_13] : memref<1x1x182x4xf32, #tpu.memory_space<vmem>>, vector<1x1x144x4xf32>
    %12 = vector.shape_cast %11 : vector<1x1x144x4xf32> to vector<144x4xf32>
    %c8 = arith.constant 8 : index
    %c0_14 = arith.constant 0 : index
    %13 = vector.load %arg3[%c8, %c0_14] : memref<36x128xf32, #tpu.memory_space<vmem>>, vector<4x128xf32>
    %cst_15 = arith.constant dense<0.000000e+00> : vector<144x128xf32>
    %14 = tpu.matmul %12, %13, %cst_15 {dimension_numbers = #tpu.dot_dimension_numbers<[1], [0], [0], [1], [0, 0, 1, 1], [], []>} : vector<144x4xf32>, vector<4x128xf32>, vector<144x128xf32> -> vector<144x128xf32>
    %15 = arith.addf %10, %14 : vector<144x128xf32>
    %c0_16 = arith.constant 0 : index
    %c0_17 = arith.constant 0 : index
    %c18 = arith.constant 18 : index
    %c0_18 = arith.constant 0 : index
    %16 = vector.load %arg2[%c0_16, %c0_17, %c18, %c0_18] : memref<1x1x182x4xf32, #tpu.memory_space<vmem>>, vector<1x1x144x4xf32>
    %17 = vector.shape_cast %16 : vector<1x1x144x4xf32> to vector<144x4xf32>
    %c12 = arith.constant 12 : index
    %c0_19 = arith.constant 0 : index
    %18 = vector.load %arg3[%c12, %c0_19] : memref<36x128xf32, #tpu.memory_space<vmem>>, vector<4x128xf32>
    %cst_20 = arith.constant dense<0.000000e+00> : vector<144x128xf32>
    %19 = tpu.matmul %17, %18, %cst_20 {dimension_numbers = #tpu.dot_dimension_numbers<[1], [0], [0], [1], [0, 0, 1, 1], [], []>} : vector<144x4xf32>, vector<4x128xf32>, vector<144x128xf32> -> vector<144x128xf32>
    %20 = arith.addf %15, %19 : vector<144x128xf32>
    %c0_21 = arith.constant 0 : index
    %c0_22 = arith.constant 0 : index
    %c19 = arith.constant 19 : index
    %c0_23 = arith.constant 0 : index
    %21 = vector.load %arg2[%c0_21, %c0_22, %c19, %c0_23] : memref<1x1x182x4xf32, #tpu.memory_space<vmem>>, vector<1x1x144x4xf32>
    %22 = vector.shape_cast %21 : vector<1x1x144x4xf32> to vector<144x4xf32>
    %c16 = arith.constant 16 : index
    %c0_24 = arith.constant 0 : index
    %23 = vector.load %arg3[%c16, %c0_24] : memref<36x128xf32, #tpu.memory_space<vmem>>, vector<4x128xf32>
    %cst_25 = arith.constant dense<0.000000e+00> : vector<144x128xf32>
    %24 = tpu.matmul %22, %23, %cst_25 {dimension_numbers = #tpu.dot_dimension_numbers<[1], [0], [0], [1], [0, 0, 1, 1], [], []>} : vector<144x4xf32>, vector<4x128xf32>, vector<144x128xf32> -> vector<144x128xf32>
    %25 = arith.addf %20, %24 : vector<144x128xf32>
    %c0_26 = arith.constant 0 : index
    %c0_27 = arith.constant 0 : index
    %c20 = arith.constant 20 : index
    %c0_28 = arith.constant 0 : index
    %26 = vector.load %arg2[%c0_26, %c0_27, %c20, %c0_28] : memref<1x1x182x4xf32, #tpu.memory_space<vmem>>, vector<1x1x144x4xf32>
    %27 = vector.shape_cast %26 : vector<1x1x144x4xf32> to vector<144x4xf32>
    %c20_29 = arith.constant 20 : index
    %c0_30 = arith.constant 0 : index
    %28 = vector.load %arg3[%c20_29, %c0_30] : memref<36x128xf32, #tpu.memory_space<vmem>>, vector<4x128xf32>
    %cst_31 = arith.constant dense<0.000000e+00> : vector<144x128xf32>
    %29 = tpu.matmul %27, %28, %cst_31 {dimension_numbers = #tpu.dot_dimension_numbers<[1], [0], [0], [1], [0, 0, 1, 1], [], []>} : vector<144x4xf32>, vector<4x128xf32>, vector<144x128xf32> -> vector<144x128xf32>
    %30 = arith.addf %25, %29 : vector<144x128xf32>
    %c0_32 = arith.constant 0 : index
    %c0_33 = arith.constant 0 : index
    %c36 = arith.constant 36 : index
    %c0_34 = arith.constant 0 : index
    %31 = vector.load %arg2[%c0_32, %c0_33, %c36, %c0_34] : memref<1x1x182x4xf32, #tpu.memory_space<vmem>>, vector<1x1x144x4xf32>
    %32 = vector.shape_cast %31 : vector<1x1x144x4xf32> to vector<144x4xf32>
    %c24 = arith.constant 24 : index
    %c0_35 = arith.constant 0 : index
    %33 = vector.load %arg3[%c24, %c0_35] : memref<36x128xf32, #tpu.memory_space<vmem>>, vector<4x128xf32>
    %cst_36 = arith.constant dense<0.000000e+00> : vector<144x128xf32>
    %34 = tpu.matmul %32, %33, %cst_36 {dimension_numbers = #tpu.dot_dimension_numbers<[1], [0], [0], [1], [0, 0, 1, 1], [], []>} : vector<144x4xf32>, vector<4x128xf32>, vector<144x128xf32> -> vector<144x128xf32>
    %35 = arith.addf %30, %34 : vector<144x128xf32>
    %c0_37 = arith.constant 0 : index
    %c0_38 = arith.constant 0 : index
    %c37 = arith.constant 37 : index
    %c0_39 = arith.constant 0 : index
    %36 = vector.load %arg2[%c0_37, %c0_38, %c37, %c0_39] : memref<1x1x182x4xf32, #tpu.memory_space<vmem>>, vector<1x1x144x4xf32>
    %37 = vector.shape_cast %36 : vector<1x1x144x4xf32> to vector<144x4xf32>
    %c28 = arith.constant 28 : index
    %c0_40 = arith.constant 0 : index
    %38 = vector.load %arg3[%c28, %c0_40] : memref<36x128xf32, #tpu.memory_space<vmem>>, vector<4x128xf32>
    %cst_41 = arith.constant dense<0.000000e+00> : vector<144x128xf32>
    %39 = tpu.matmul %37, %38, %cst_41 {dimension_numbers = #tpu.dot_dimension_numbers<[1], [0], [0], [1], [0, 0, 1, 1], [], []>} : vector<144x4xf32>, vector<4x128xf32>, vector<144x128xf32> -> vector<144x128xf32>
    %40 = arith.addf %35, %39 : vector<144x128xf32>
    %c0_42 = arith.constant 0 : index
    %c0_43 = arith.constant 0 : index
    %c38 = arith.constant 38 : index
    %c0_44 = arith.constant 0 : index
    %41 = vector.load %arg2[%c0_42, %c0_43, %c38, %c0_44] : memref<1x1x182x4xf32, #tpu.memory_space<vmem>>, vector<1x1x144x4xf32>
    %42 = vector.shape_cast %41 : vector<1x1x144x4xf32> to vector<144x4xf32>
    %c32 = arith.constant 32 : index
    %c0_45 = arith.constant 0 : index
    %43 = vector.load %arg3[%c32, %c0_45] : memref<36x128xf32, #tpu.memory_space<vmem>>, vector<4x128xf32>
    %cst_46 = arith.constant dense<0.000000e+00> : vector<144x128xf32>
    %44 = tpu.matmul %42, %43, %cst_46 {dimension_numbers = #tpu.dot_dimension_numbers<[1], [0], [0], [1], [0, 0, 1, 1], [], []>} : vector<144x4xf32>, vector<4x128xf32>, vector<144x128xf32> -> vector<144x128xf32>
    %45 = arith.addf %40, %44 : vector<144x128xf32>
    %c0_47 = arith.constant 0 : index
    %c0_48 = arith.constant 0 : index
    %46 = vector.load %arg4[%c0_47, %c0_48] : memref<1x128xf32, #tpu.memory_space<vmem>>, vector<1x128xf32>
    %47 = vector.broadcast %46 : vector<1x128xf32> to vector<144x128xf32>
    %48 = arith.mulf %45, %47 : vector<144x128xf32>
    %c0_49 = arith.constant 0 : index
    %c0_50 = arith.constant 0 : index
    %49 = vector.load %arg5[%c0_49, %c0_50] : memref<1x128xf32, #tpu.memory_space<vmem>>, vector<1x128xf32>
    %50 = vector.broadcast %49 : vector<1x128xf32> to vector<144x128xf32>
    %51 = arith.addf %48, %50 : vector<144x128xf32>
    %cst_51 = arith.constant 0.000000e+00 : f32
    %52 = vector.broadcast %cst_51 : f32 to vector<144x128xf32>
    %53 = arith.maximumf %51, %52 : vector<144x128xf32>
    %c0_52 = arith.constant 0 : index
    %c0_53 = arith.constant 0 : index
    %c0_54 = arith.constant 0 : index
    %c0_55 = arith.constant 0 : index
    %54 = vector.load %arg6[%c0_52, %c0_53, %c0_54, %c0_55] : memref<1x1x144x128xf32, #tpu.memory_space<vmem>>, vector<1x1x144x128xf32>
    %55 = vector.shape_cast %54 : vector<1x1x144x128xf32> to vector<144x128xf32>
    %56 = vector.shape_cast %53 : vector<144x128xf32> to vector<1x1x144x128xf32>
    tpu.vector_store %arg6[%c0_52, %c0_53, %c0_54, %c0_55], %56 {strides = array<i32>} : memref<1x1x144x128xf32, #tpu.memory_space<vmem>>, vector<1x1x144x128xf32>,
    return
  }
  func.func @transform_0(%arg0: i32, %arg1: i32) -> (i32, i32, i32, i32) {
    %c0_i32 = arith.constant 0 : i32
    %c0_i32_0 = arith.constant 0 : i32
    %c0_i32_1 = arith.constant 0 : i32
    return %arg0, %arg1, %c0_i32, %c0_i32_0 : i32, i32, i32, i32
  }
  func.func @transform_1(%arg0: i32, %arg1: i32) -> (i32, i32) {
    %c0_i32 = arith.constant 0 : i32
    %c0_i32_0 = arith.constant 0 : i32
    %c0_i32_1 = arith.constant 0 : i32
    return %c0_i32, %c0_i32_0 : i32, i32
  }
  func.func @transform_2(%arg0: i32, %arg1: i32) -> (i32, i32) {
    %c0_i32 = arith.constant 0 : i32
    %c0_i32_0 = arith.constant 0 : i32
    %c0_i32_1 = arith.constant 0 : i32
    return %c0_i32, %c0_i32_0 : i32, i32
  }
  func.func @transform_3(%arg0: i32, %arg1: i32) -> (i32, i32) {
    %c0_i32 = arith.constant 0 : i32
    %c0_i32_0 = arith.constant 0 : i32
    %c0_i32_1 = arith.constant 0 : i32
    return %c0_i32, %c0_i32_0 : i32, i32
  }
  func.func @transform_4(%arg0: i32, %arg1: i32) -> (i32, i32, i32, i32) {
    %c0_i32 = arith.constant 0 : i32
    %c0_i32_0 = arith.constant 0 : i32
    %c0_i32_1 = arith.constant 0 : i32
    return %arg0, %arg1, %c0_i32, %c0_i32_0 : i32, i32, i32, i32
  }
}

</mosaic_0001>

<bundles_post_ra>
// kernel: _input_conv_block_impl.3
= control target key start
LH: loop header
LB: loop body
LE: loop exit
PB: predicated region body
PF: predicated region fallthrough
CT: control target
= control target key end

     0   :  { %s3491_s15 = smov 0   ;;  %s3493_s16 = smov 0   ;;  %s4035_s0 = inlined_call_operand.vmem [shape: f32[2,2,182,4], index: 0, kind: input, shape index: {}]   ;;  %s4036_s1 = inlined_call_operand.vmem [shape: f32[36,128], index: 1, kind: input, shape index: {}]   ;;  %s4037_s2 = inlined_call_operand.vmem [shape: f32[1,128], index: 2, kind: input, shape index: {}]   ;;  %s4038_s3 = inlined_call_operand.vmem [shape: f32[1,128], index: 3, kind: input, shape index: {}]   ;;  %s4039_s4 = inlined_call_operand.vmem [shape: f32[2,2,144,128], index: 4, kind: output, shape index: {}]  }
   0x1   :  { %s3495_s17 = smov 0   ;;  %s3497_s18 = smov 0  }
   0x2   :  { %s3499_s19 = smov 0  }
   0x3 LB: > { %s23_s20 = sadd.s32 1, %s3456_s17  ;;  %s26_s21 = sadd.s32 1, %s3460_s18  ;;  %s3464_s19 = sphi %s3499_s19, %s14_s19   ;;  %s3460_s18 = sphi %s3497_s18, %s4043_s18   ;;  %s3456_s17 = sphi %s3495_s17, %s4042_s17   ;;  %s3452_s16 = sphi %s3493_s16, %s4041_s16   ;;  %s3448_s15 = sphi %s3491_s15, %s4040_s15  }
   0x4   : > { %p24_p0 = scmp.ge.s32.totalorder %s23_s20, 2  ;;  %p2626_p1 = scmp.ge.s32.totalorder %s3464_s19, 1 }
   0x5   : > { %p182_p2 = scmp.lt.s32.totalorder %s3464_s19, 5 }
   0x6   : > { %s4045_s20 = smov (%p24_p0, %s23_s20), 0  ;;  %s4047_s21 = smov (!%p24_p0, %s26_s21), %s3460_s18 }
   0x7   : > { %p183_p3 = pnand %p2626_p1, %p182_p2  ;;  %p28_p4 = scmp.ge.s32.totalorder %s4047_s21, 2 }
   0x8   : > { %vm327_vm0 = vcmask (!%p183_p3), 1043456   ;;  %v3524_v0 = vld [vmem:[%s4036_s1 + $0x10] sm:$0xf] (!%p183_p3)  ;;  %v271_v1 = vld [vmem:[%s4036_s1 + $0x4] sm:$0xf] (!%p183_p3)  ;;  %p216_p5 = scmp.lt.s32.totalorder (!%p183_p3), %s3452_s16, 1 }
   0x9   : > { %s4049_s21 = smov (%p28_p4, %s4047_s21), 0  ;;  %186 = sbr.rel (%p183_p3) target bundleno = 407 (0x197), region = 36 }
   0xa   : > { %3091 = vmatprep.subr.msk.mxu0 (!%p183_p3), %vm327_vm0, %v3524_v0  ;;  %2975 = vmatprep.subr.msk.mxu1 (!%p183_p3), %vm327_vm0, %v271_v1  ;;  %p218_p6 = scmp.lt.s32.totalorder (!%p183_p3), %s3448_s15, 1  ;;  %v1463_v2 = vld [vmem:[%s4036_s1 + $0x14] sm:$0xf] (!%p183_p3)  ;;  %v252_v3 = vld [vmem:[%s4036_s1] sm:$0xf] (!%p183_p3)  ;;  %vm272_vm1 = vcmask (!%p183_p3), 31744  }
   0xb   : > { %3092 = vmatpush3.msk.msra.mxu0 (!%p183_p3), %vm327_vm0, %v3524_v0  ;;  %2976 = vmatpush3.msk.msra.mxu1 (!%p183_p3), %vm327_vm0, %v271_v1  ;;  %v1712_v10 = vld [vmem:[%s4036_s1 + $0x18] sm:$0xf] (!%p183_p3)  ;;  %v3570_v11 = vld [vmem:[%s4036_s1 + $0x8] sm:$0xf] (!%p183_p3)  ;;  %v3620_v32 = vld [vmem:[%s4036_s1 + $0x1c] sm:$0xf] (!%p183_p3) }
   0xc   : > { %3120 = vmatprep.subr.msk.mxu0 (!%p183_p3), %vm327_vm0, %v1463_v2  ;;  %3004 = vmatprep.subr.msk.mxu1 (!%p183_p3), %vm327_vm0, %v252_v3  ;;  %v3686_v49 = vld [vmem:[%s4036_s1 + $0xc] sm:$0xf] (!%p183_p3) }
  0x10   : > { %s4051_s16 = smov (!%p216_p5, %s3452_s16), 1  ;;  %s4053_s15 = smov (!%p218_p6, %s3448_s15), 1 }
  0x11   : > { %s3383_s30 = smul.u32 46, %s4051_s16 }
  0x12   : > { %s3382_s5 = smul.u32 23, %s4053_s15 }
  0x13   : > { %s3384_s28 = smul.u32 18, %s4053_s15 }
  0x14   : > { %s222_s6 = sadd.s32 %s3383_s30, %s3382_s5  ;;  %s3385_s29 = smul.u32 36, %s4051_s16 }
  0x15   : > { %s2627_s7 = sshll.u32 %s222_s6, 3 }
  0x16   : > { %s3552_s10 = scalar_lea.vmem %s4035_s0, %s2627_s7  ;;  %s231_s30 = sadd.s32 %s3385_s29, %s3384_s28 }
  0x17   : > { %v253_v4 = vld [vmem:[%s3552_s10 + $0x1] sm:$0xff]  ;;  %v1196_v5 = vld [vmem:[%s3552_s10 + $0x13] sm:$0xff]  ;;  %v254_v6 = vld [vmem:[%s3552_s10 + $0x9] sm:$0xff]  ;;  %s2628_s9 = sshll.u32 %s231_s30, 3 }
  0x18   : > { %2977 = vmatprep.mubr.msk.f32.mxu1 %vm272_vm1, %v253_v4  ;;  %3093 = vmatprep.mubr.msk.f32.mxu0 %vm272_vm1, %v1196_v5  ;;  %v1197_v7 = vld [vmem:[%s3552_s10 + $0x1b] sm:$0xff]  ;;  %v255_v8 = vld [vmem:[%s3552_s10 + $0x11] sm:$0xff]  ;;  %v1198_v9 = vld [vmem:[%s3552_s10 + $0x23] sm:$0xff] }
  0x19   : > { %2978 = vmatmul.mubr.msk.f32.vlgmr.msra.gmra.mrb[0].mxu1 %vm272_vm1, %v254_v6  ;;  %3094 = vmatmul.mubr.msk.f32.vlgmr.msra.gmra.mrb[0].mxu0 %vm272_vm1, %v1197_v7  ;;  %v256_v12 = vld [vmem:[%s3552_s10 + $0x19] sm:$0xff]  ;;  %v1199_v13 = vld [vmem:[%s3552_s10 + $0x2b] sm:$0xff]  ;;  %v257_v14 = vld [vmem:[%s3552_s10 + $0x21] sm:$0xff] }
  0x1a   : > { %3121 = vmatpush3.msk.msra.mxu0 %vm327_vm0, %v1463_v2  ;;  %2980 = vmatprep.mubr.msk.f32.mxu1 %vm272_vm1, %v255_v8  ;;  %v1200_v15 = vld [vmem:[%s3552_s10 + $0x33] sm:$0xff]  ;;  %v258_v16 = vld [vmem:[%s3552_s10 + $0x29] sm:$0xff]  ;;  %v1201_v17 = vld [vmem:[%s3552_s10 + $0x3b] sm:$0xff] }
  0x1b   : > { %3096 = vmatprep.mubr.msk.f32.mxu0 %vm272_vm1, %v1198_v9  ;;  %3005 = vmatpush3.msk.msra.mxu1 %vm327_vm0, %v252_v3  ;;  %v259_v18 = vld [vmem:[%s3552_s10 + $0x31] sm:$0xff]  ;;  %v1202_v19 = vld [vmem:[%s3552_s10 + $0x43] sm:$0xff]  ;;  %v260_v20 = vld [vmem:[%s3552_s10 + $0x39] sm:$0xff] }
  0x1c   : > { %3149 = vmatprep.subr.msk.mxu0 %vm327_vm0, %v1712_v10  ;;  %3033 = vmatprep.subr.msk.mxu1 %vm327_vm0, %v3570_v11  ;;  %v1203_v21 = vld [vmem:[%s3552_s10 + $0x4b] sm:$0xff]  ;;  %v261_v22 = vld [vmem:[%s3552_s10 + $0x41] sm:$0xff]  ;;  %v1204_v23 = vld [vmem:[%s3552_s10 + $0x53] sm:$0xff] }
  0x1d   : > { %2981 = vmatmul.mubr.msk.f32.gmra.mrb[2].mxu1 %vm272_vm1, %v256_v12  ;;  %3097 = vmatmul.mubr.msk.f32.gmra.mrb[2].mxu0 %vm272_vm1, %v1199_v13  ;;  %v262_v24 = vld [vmem:[%s3552_s10 + $0x49] sm:$0xff]  ;;  %v1205_v25 = vld [vmem:[%s3552_s10 + $0x5b] sm:$0xff]  ;;  %v263_v26 = vld [vmem:[%s3552_s10 + $0x51] sm:$0xff] }
  0x1e   : > { %2983 = vmatprep.mubr.msk.f32.mxu1 %vm272_vm1, %v257_v14  ;;  %3099 = vmatprep.mubr.msk.f32.mxu0 %vm272_vm1, %v1200_v15  ;;  %v1445_v27 = vld [vmem:[%s3552_s10 + $0x14] sm:$0xff]  ;;  %v1446_v29 = vld [vmem:[%s3552_s10 + $0x1c] sm:$0xff]  ;;  %v3615_v31 = vld [vmem:[%s3552_s10 + $0x24] sm:$0xff] }
  0x1f   : > { %v264_v28 = vld [vmem:[%s3552_s10 + $0x59] sm:$0xff]  ;;  %v265_v30 = vld [vmem:[%s3552_s10 + $0x61] sm:$0xff]  ;;  %v266_v33 = vld [vmem:[%s3552_s10 + $0x69] sm:$0xff] }
  0x20   : > { %v3628_v34 = vld [vmem:[%s3552_s10 + $0x2c] sm:$0xff]  ;;  %v3634_v36 = vld [vmem:[%s3552_s10 + $0x34] sm:$0xff]  ;;  %v3646_v38 = vld [vmem:[%s3552_s10 + $0x3c] sm:$0xff] }
  0x21   : > { %2984 = vmatmul.mubr.msk.f32.gmra.mrb[4].mxu1 %vm272_vm1, %v258_v16  ;;  %3100 = vmatmul.mubr.msk.f32.gmra.mrb[4].mxu0 %vm272_vm1, %v1201_v17  ;;  %v267_v35 = vld [vmem:[%s3552_s10 + $0x71] sm:$0xff]  ;;  %v268_v37 = vld [vmem:[%s3552_s10 + $0x79] sm:$0xff]  ;;  %v269_v39 = vld [vmem:[%s3552_s10 + $0x81] sm:$0xff] }
  0x22   : > { %2986 = vmatprep.mubr.msk.f32.mxu1 %vm272_vm1, %v259_v18  ;;  %3102 = vmatprep.mubr.msk.f32.mxu0 %vm272_vm1, %v1202_v19  ;;  %v3650_v40 = vld [vmem:[%s3552_s10 + $0x44] sm:$0xff]  ;;  %v3660_v42 = vld [vmem:[%s3552_s10 + $0x4c] sm:$0xff]  ;;  %v3664_v44 = vld [vmem:[%s3552_s10 + $0x54] sm:$0xff] }
  0x23   : > { %v270_v41 = vld [vmem:[%s3552_s10 + $0x89] sm:$0xff]  ;;  %v234_v43 = vld [vmem:[%s3552_s10] sm:$0xff]  ;;  %v237_v50 = vld [vmem:[%s3552_s10 + $0x18] sm:$0xff] }
  0x24   : > { %v235_v45 = vld [vmem:[%s3552_s10 + $0x8] sm:$0xff]  ;;  %v3674_v46 = vld [vmem:[%s3552_s10 + $0x5c] sm:$0xff]  ;;  %v236_v47 = vld [vmem:[%s3552_s10 + $0x10] sm:$0xff] }
  0x25   : > { %2987 = vmatmul.mubr.msk.f32.gmra.mrb[6].mxu1 %vm272_vm1, %v260_v20  ;;  %3103 = vmatmul.mubr.msk.f32.gmra.mrb[6].mxu0 %vm272_vm1, %v1203_v21  ;;  %v3678_v48 = vld [vmem:[%s3552_s10 + $0x64] sm:$0xff]  ;;  %v1456_v51 = vld [vmem:[%s3552_s10 + $0x6c] sm:$0xff]  ;;  %v1457_v53 = vld [vmem:[%s3552_s10 + $0x74] sm:$0xff] }
  0x26   : > { %2989 = vmatprep.mubr.msk.f32.mxu1 %vm272_vm1, %v261_v22  ;;  %3105 = vmatprep.mubr.msk.f32.mxu0 %vm272_vm1, %v1204_v23  ;;  %v238_v52 = vld [vmem:[%s3552_s10 + $0x20] sm:$0xff]  ;;  %v239_v54 = vld [vmem:[%s3552_s10 + $0x28] sm:$0xff]  ;;  %v240_v56 = vld [vmem:[%s3552_s10 + $0x30] sm:$0xff] }
  0x27   : > { %v1458_v55 = vld [vmem:[%s3552_s10 + $0x7c] sm:$0xff]  ;;  %v1459_v57 = vld [vmem:[%s3552_s10 + $0x84] sm:$0xff]  ;;  %v1460_v59 = vld [vmem:[%s3552_s10 + $0x8c] sm:$0xff] }
  0x28   : > { %v241_v58 = vld [vmem:[%s3552_s10 + $0x38] sm:$0xff]  ;;  %v242_v60 = vld [vmem:[%s3552_s10 + $0x40] sm:$0xff]  ;;  %v243_v62 = vld [vmem:[%s3552_s10 + $0x48] sm:$0xff] }
  0x29   : > { %2990 = vmatmul.mubr.msk.f32.gmra.mrb[8].mxu1 %vm272_vm1, %v262_v24  ;;  %3106 = vmatmul.mubr.msk.f32.gmra.mrb[8].mxu0 %vm272_vm1, %v1205_v25  ;;  %v1461_v61 = vld [vmem:[%s3552_s10 + $0x94] sm:$0xff]  ;;  %v1462_v63 = vld [vmem:[%s3552_s10 + $0x9c] sm:$0xff]  ;;  %v247_v5 = vld [vmem:[%s3552_s10 + $0x68] sm:$0xff] }
  0x2a   : > { %2992 = vmatprep.mubr.msk.f32.mxu1 %vm272_vm1, %v263_v26  ;;  %3122 = vmatprep.mubr.msk.f32.mxu0 %vm272_vm1, %v1445_v27  ;;  %v244_v1 = vld [vmem:[%s3552_s10 + $0x50] sm:$0xff]  ;;  %v245_v2 = vld [vmem:[%s3552_s10 + $0x58] sm:$0xff]  ;;  %v246_v3 = vld [vmem:[%s3552_s10 + $0x60] sm:$0xff] }
  0x2b   : > { %v3732_v4 = vld [vmem:[%s4036_s1 + $0x20] sm:$0xf]  ;;  %v248_v6 = vld [vmem:[%s3552_s10 + $0x70] sm:$0xff]  ;;  %v249_v7 = vld [vmem:[%s3552_s10 + $0x78] sm:$0xff] }
  0x2c   : > { %v250_v8 = vld [vmem:[%s3552_s10 + $0x80] sm:$0xff]  ;;  %v251_v9 = vld [vmem:[%s3552_s10 + $0x88] sm:$0xff]  ;;  %v3770_v12 = vld [vmem:[%s3552_s10 + $0x12] sm:$0xff] }
  0x2d   : > { %2993 = vmatmul.mubr.msk.f32.gmra.mrb[10].mxu1 %vm272_vm1, %v264_v28  ;;  %3123 = vmatmul.mubr.msk.f32.vlgmr.msra.gmra.mrb[0].mxu0 %vm272_vm1, %v1446_v29  ;;  %v3778_v13 = vld [vmem:[%s3552_s10 + $0x1a] sm:$0xff]  ;;  %v3783_v14 = vld [vmem:[%s3552_s10 + $0x22] sm:$0xff]  ;;  %v703_v15 = vld [vmem:[%s3552_s10 + $0x2a] sm:$0xff] }
  0x2e   : > { %3150 = vmatpush3.msk.msra.mxu0 %vm327_vm0, %v1712_v10  ;;  %2995 = vmatprep.mubr.msk.f32.mxu1 %vm272_vm1, %v265_v30  ;;  %v698_v10 = vld [vmem:[%s3552_s10 + $0x2] sm:$0xff]  ;;  %v3795_v16 = vld [vmem:[%s3552_s10 + $0x32] sm:$0xff]  ;;  %v705_v17 = vld [vmem:[%s3552_s10 + $0x3a] sm:$0xff] }
  0x2f   : > { %3125 = vmatprep.mubr.msk.f32.mxu0 %vm272_vm1, %v3615_v31  ;;  %3178 = vmatprep.subr.msk.mxu0 %vm327_vm0, %v3620_v32  ;;  %v3804_v18 = vld [vmem:[%s3552_s10 + $0x42] sm:$0xff]  ;;  %v707_v20 = vld [vmem:[%s3552_s10 + $0x4a] sm:$0xff]  ;;  %v708_v22 = vld [vmem:[%s3552_s10 + $0x52] sm:$0xff] }
  0x30   : > { %v1710_v19 = vld [vmem:[%s3552_s10 + $0xa4] sm:$0xff]  ;;  %v1711_v21 = vld [vmem:[%s3552_s10 + $0xac] sm:$0xff]  ;;  %v709_v24 = vld [vmem:[%s3552_s10 + $0x5a] sm:$0xff] }
  0x31   : > { %2996 = vmatmul.mubr.msk.f32.gmra.mrb[12].mxu1 %vm272_vm1, %v266_v33  ;;  %3126 = vmatmul.mubr.msk.f32.gmra.mrb[2].mxu0 %vm272_vm1, %v3628_v34  ;;  %v1943_v23 = vld [vmem:[%s3552_s10 + $0x25] sm:$0xff]  ;;  %v1944_v25 = vld [vmem:[%s3552_s10 + $0x2d] sm:$0xff]  ;;  %v1945_v27 = vld [vmem:[%s3552_s10 + $0x35] sm:$0xff] }
  0x32   : > { %2998 = vmatprep.mubr.msk.f32.mxu1 %vm272_vm1, %v267_v35  ;;  %3128 = vmatprep.mubr.msk.f32.mxu0 %vm272_vm1, %v3634_v36  ;;  %v710_v26 = vld [vmem:[%s3552_s10 + $0x62] sm:$0xff]  ;;  %v711_v28 = vld [vmem:[%s3552_s10 + $0x6a] sm:$0xff]  ;;  %v712_v30 = vld [vmem:[%s3552_s10 + $0x72] sm:$0xff] }
  0x33   : > { %v1946_v29 = vld [vmem:[%s3552_s10 + $0x3d] sm:$0xff]  ;;  %v1948_v33 = vld [vmem:[%s3552_s10 + $0x4d] sm:$0xff]  ;;  %v1949_v35 = vld [vmem:[%s3552_s10 + $0x55] sm:$0xff] }
  0x35   : > { %2999 = vmatmul.mubr.msk.f32.gmra.mrb[14].mxu1 %vm272_vm1, %v268_v37  ;;  %3129 = vmatmul.mubr.msk.f32.gmra.mrb[4].mxu0 %vm272_vm1, %v3646_v38  ;;  %v1950_v37 = vld [vmem:[%s3552_s10 + $0x5d] sm:$0xff] }
  0x36   : > { %3001 = vmatprep.mubr.msk.f32.mxu1 %vm272_vm1, %v269_v39  ;;  %3131 = vmatprep.mubr.msk.f32.mxu0 %vm272_vm1, %v3650_v40  ;;  %v1952_v39 = vld [vmem:[%s3552_s10 + $0x6d] sm:$0xff] }
  0x39   : > { %3002 = vmatmul.mubr.msk.f32.gmra.mrb[16].mxu1 %vm272_vm1, %v270_v41  ;;  %3132 = vmatmul.mubr.msk.f32.gmra.mrb[6].mxu0 %vm272_vm1, %v3660_v42  ;;  %v1954_v41 = vld [vmem:[%s3552_s10 + $0x7d] sm:$0xff] }
  0x3a   : > { %3006 = vmatprep.mubr.msk.f32.mxu1 %vm272_vm1, %v234_v43  ;;  %3134 = vmatprep.mubr.msk.f32.mxu0 %vm272_vm1, %v3664_v44  ;;  %v1956_v43 = vld [vmem:[%s3552_s10 + $0x8d] sm:$0xff] }
  0x3d   : > { %3007 = vmatmul.mubr.msk.f32.vlgmr.msra.gmra.mrb[0].mxu1 %vm272_vm1, %v235_v45  ;;  %3135 = vmatmul.mubr.msk.f32.gmra.mrb[8].mxu0 %vm272_vm1, %v3674_v46  ;;  %v1959_v45 = vld [vmem:[%s3552_s10 + $0xa5] sm:$0xff] }
  0x3e   : > { %3009 = vmatprep.mubr.msk.f32.mxu1 %vm272_vm1, %v236_v47  ;;  %3137 = vmatprep.mubr.msk.f32.mxu0 %vm272_vm1, %v3678_v48  ;;  %v2192_v47 = vld [vmem:[%s3552_s10 + $0x26] sm:$0xff] }
  0x3f   : > { %3034 = vmatpush3.msk.msra.mxu1 %vm327_vm0, %v3570_v11  ;;  %v699_v11 = vld [vmem:[%s3552_s10 + $0xa] sm:$0xff] }
  0x40   : > { %3062 = vmatprep.subr.msk.mxu1 %vm327_vm0, %v3686_v49 }
  0x41   : > { %3010 = vmatmul.mubr.msk.f32.gmra.mrb[2].mxu1 %vm272_vm1, %v237_v50  ;;  %3138 = vmatmul.mubr.msk.f32.gmra.mrb[10].mxu0 %vm272_vm1, %v1456_v51  ;;  %v2195_v50 = vld [vmem:[%s3552_s10 + $0x3e] sm:$0xff] }
  0x42   : > { %3012 = vmatprep.mubr.msk.f32.mxu1 %vm272_vm1, %v238_v52  ;;  %3140 = vmatprep.mubr.msk.f32.mxu0 %vm272_vm1, %v1457_v53  ;;  %v2197_v52 = vld [vmem:[%s3552_s10 + $0x4e] sm:$0xff] }
  0x45   : > { %3013 = vmatmul.mubr.msk.f32.gmra.mrb[4].mxu1 %vm272_vm1, %v239_v54  ;;  %3141 = vmatmul.mubr.msk.f32.gmra.mrb[12].mxu0 %vm272_vm1, %v1458_v55  ;;  %v2198_v54 = vld [vmem:[%s3552_s10 + $0x56] sm:$0xff] }
  0x46   : > { %3015 = vmatprep.mubr.msk.f32.mxu1 %vm272_vm1, %v240_v56  ;;  %3143 = vmatprep.mubr.msk.f32.mxu0 %vm272_vm1, %v1459_v57  ;;  %v2199_v56 = vld [vmem:[%s3552_s10 + $0x5e] sm:$0xff] }
  0x49   : > { %3016 = vmatmul.mubr.msk.f32.gmra.mrb[6].mxu1 %vm272_vm1, %v241_v58  ;;  %3144 = vmatmul.mubr.msk.f32.gmra.mrb[14].mxu0 %vm272_vm1, %v1460_v59  ;;  %v2200_v58 = vld [vmem:[%s3552_s10 + $0x66] sm:$0xff] }
  0x4a   : > { %3018 = vmatprep.mubr.msk.f32.mxu1 %vm272_vm1, %v242_v60  ;;  %3146 = vmatprep.mubr.msk.f32.mxu0 %vm272_vm1, %v1461_v61  ;;  %v2201_v60 = vld [vmem:[%s3552_s10 + $0x6e] sm:$0xff] }
  0x4d   : > { %3019 = vmatmul.mubr.msk.f32.gmra.mrb[8].mxu1 %vm272_vm1, %v243_v62  ;;  %3147 = vmatmul.mubr.msk.f32.gmra.mrb[16].mxu0 %vm272_vm1, %v1462_v63  ;;  %v2202_v62 = vld [vmem:[%s3552_s10 + $0x76] sm:$0xff] }
  0x4e   : > { %3021 = vmatprep.mubr.msk.f32.mxu1 %vm272_vm1, %v244_v1  ;;  %3151 = vmatprep.mubr.msk.f32.mxu0 %vm272_vm1, %v3615_v31  ;;  %v1947_v31 = vld [vmem:[%s3552_s10 + $0x45] sm:$0xff] }
  0x4f   : > { %v2203_v1 = vld [vmem:[%s3552_s10 + $0x7e] sm:$0xff] }
  0x51   : > { %3022 = vmatmul.mubr.msk.f32.gmra.mrb[10].mxu1 %vm272_vm1, %v245_v2  ;;  %3152 = vmatmul.mubr.msk.f32.vlgmr.msra.gmra.mrb[0].mxu0 %vm272_vm1, %v3628_v34  ;;  %v714_v34 = vld [vmem:[%s3552_s10 + $0x82] sm:$0xff] }
  0x52   : > { %3179 = vmatpush3.msk.msra.mxu0 %vm327_vm0, %v3620_v32  ;;  %3024 = vmatprep.mubr.msk.f32.mxu1 %vm272_vm1, %v246_v3  ;;  %v713_v32 = vld [vmem:[%s3552_s10 + $0x7a] sm:$0xff]  ;;  %v1210_v2 = vld [vmem:[%s3552_s10 + $0x83] sm:$0xff] }
  0x53   : > { %3154 = vmatprep.mubr.msk.f32.mxu0 %vm272_vm1, %v3634_v36  ;;  %3207 = vmatprep.subr.msk.mxu0 %vm327_vm0, %v3732_v4  ;;  %v715_v36 = vld [vmem:[%s3552_s10 + $0x8a] sm:$0xff] }
  0x54   : > { %v2204_v3 = vld [vmem:[%s3552_s10 + $0x86] sm:$0xff] }
  0x55   : > { %3025 = vmatmul.mubr.msk.f32.gmra.mrb[12].mxu1 %vm272_vm1, %v247_v5  ;;  %3155 = vmatmul.mubr.msk.f32.gmra.mrb[2].mxu0 %vm272_vm1, %v3646_v38  ;;  %v1951_v38 = vld [vmem:[%s3552_s10 + $0x65] sm:$0xff]  ;;  %v2205_v5 = vld [vmem:[%s3552_s10 + $0x8e] sm:$0xff] }
  0x56   : > { %3027 = vmatprep.mubr.msk.f32.mxu1 %vm272_vm1, %v248_v6  ;;  %3157 = vmatprep.mubr.msk.f32.mxu0 %vm272_vm1, %v3650_v40  ;;  %v1953_v40 = vld [vmem:[%s3552_s10 + $0x75] sm:$0xff] }
  0x57   : > { %v1212_v6 = vld [vmem:[%s3552_s10 + $0x93] sm:$0xff] }
  0x59   : > { %3028 = vmatmul.mubr.msk.f32.gmra.mrb[14].mxu1 %vm272_vm1, %v249_v7  ;;  %3158 = vmatmul.mubr.msk.f32.gmra.mrb[4].mxu0 %vm272_vm1, %v3660_v42  ;;  %v1955_v42 = vld [vmem:[%s3552_s10 + $0x85] sm:$0xff]  ;;  %v2206_v7 = vld [vmem:[%s3552_s10 + $0x96] sm:$0xff] }
  0x5a   : > { %3030 = vmatprep.mubr.msk.f32.mxu1 %vm272_vm1, %v250_v8  ;;  %3160 = vmatprep.mubr.msk.f32.mxu0 %vm272_vm1, %v3664_v44  ;;  %v1957_v44 = vld [vmem:[%s3552_s10 + $0x95] sm:$0xff] }
  0x5b   : > { %v1213_v8 = vld [vmem:[%s3552_s10 + $0x9b] sm:$0xff] }
  0x5d   : > { %3031 = vmatmul.mubr.msk.f32.gmra.mrb[16].mxu1 %vm272_vm1, %v251_v9  ;;  %3161 = vmatmul.mubr.msk.f32.gmra.mrb[6].mxu0 %vm272_vm1, %v3674_v46  ;;  %v1960_v46 = vld [vmem:[%s3552_s10 + $0xad] sm:$0xff]  ;;  %v2207_v9 = vld [vmem:[%s3552_s10 + $0x9e] sm:$0xff] }
  0x5e   : > { %3035 = vmatprep.mubr.msk.f32.mxu1 %vm272_vm1, %v698_v10  ;;  %3163 = vmatprep.mubr.msk.f32.mxu0 %vm272_vm1, %v3678_v48  ;;  %v2193_v48 = vld [vmem:[%s3552_s10 + $0x2e] sm:$0xff]  ;;  %v2208_v10 = vld [vmem:[%s3552_s10 + $0xa6] sm:$0xff] }
  0x61   : > { %3036 = vmatmul.mubr.msk.f32.vlgmr.msra.gmra.mrb[0].mxu1 %vm272_vm1, %v699_v11  ;;  %3164 = vmatmul.mubr.msk.f32.gmra.mrb[8].mxu0 %vm272_vm1, %v1456_v51  ;;  %v2196_v51 = vld [vmem:[%s3552_s10 + $0x46] sm:$0xff]  ;;  %v2209_v11 = vld [vmem:[%s3552_s10 + $0xae] sm:$0xff] }
  0x62   : > { %3038 = vmatprep.mubr.msk.f32.mxu1 %vm272_vm1, %v3770_v12  ;;  %3166 = vmatprep.mubr.msk.f32.mxu0 %vm272_vm1, %v1457_v53  ;;  %v963_v53 = vld [vmem:[%s3552_s10 + $0x92] sm:$0xff] }
  0x63   : > { %3063 = vmatpush3.msk.msra.mxu1 %vm327_vm0, %v3686_v49  ;;  %v2194_v49 = vld [vmem:[%s3552_s10 + $0x36] sm:$0xff] }
  0x64   : > { %3236 = vmatprep.subr.msk.mxu1 %vm327_vm0, %v3524_v0 }
  0x65   : > { %3039 = vmatmul.mubr.msk.f32.gmra.mrb[2].mxu1 %vm272_vm1, %v3778_v13  ;;  %3167 = vmatmul.mubr.msk.f32.gmra.mrb[10].mxu0 %vm272_vm1, %v1458_v55  ;;  %v964_v55 = vld [vmem:[%s3552_s10 + $0x9a] sm:$0xff] }
  0x66   : > { %3041 = vmatprep.mubr.msk.f32.mxu1 %vm272_vm1, %v3783_v14  ;;  %3169 = vmatprep.mubr.msk.f32.mxu0 %vm272_vm1, %v1459_v57  ;;  %v1206_v57 = vld [vmem:[%s3552_s10 + $0x63] sm:$0xff] }
  0x69   : > { %3042 = vmatmul.mubr.msk.f32.gmra.mrb[4].mxu1 %vm272_vm1, %v703_v15  ;;  %3170 = vmatmul.mubr.msk.f32.gmra.mrb[12].mxu0 %vm272_vm1, %v1460_v59  ;;  %v1207_v59 = vld [vmem:[%s3552_s10 + $0x6b] sm:$0xff] }
  0x6a   : > { %3044 = vmatprep.mubr.msk.f32.mxu1 %vm272_vm1, %v3795_v16  ;;  %3172 = vmatprep.mubr.msk.f32.mxu0 %vm272_vm1, %v1461_v61  ;;  %v1208_v61 = vld [vmem:[%s3552_s10 + $0x73] sm:$0xff] }
  0x6d   : > { %3045 = vmatmul.mubr.msk.f32.gmra.mrb[6].mxu1 %vm272_vm1, %v705_v17  ;;  %3173 = vmatmul.mubr.msk.f32.gmra.mrb[14].mxu0 %vm272_vm1, %v1462_v63  ;;  %v1209_v63 = vld [vmem:[%s3552_s10 + $0x7b] sm:$0xff] }
  0x6e   : > { %3047 = vmatprep.mubr.msk.f32.mxu1 %vm272_vm1, %v3804_v18  ;;  %3175 = vmatprep.mubr.msk.f32.mxu0 %vm272_vm1, %v1710_v19 }
  0x71   : > { %3048 = vmatmul.mubr.msk.f32.gmra.mrb[8].mxu1 %vm272_vm1, %v707_v20  ;;  %3176 = vmatmul.mubr.msk.f32.gmra.mrb[16].mxu0 %vm272_vm1, %v1711_v21 }
  0x72   : > { %3050 = vmatprep.mubr.msk.f32.mxu1 %vm272_vm1, %v708_v22  ;;  %3180 = vmatprep.mubr.msk.f32.mxu0 %vm272_vm1, %v1943_v23  ;;  %v3954_v23 = vld [vmem:[%s4037_s2] ss:$0 sm:$0xff] }
  0x75   : > { %3051 = vmatmul.mubr.msk.f32.gmra.mrb[10].mxu1 %vm272_vm1, %v709_v24  ;;  %3181 = vmatmul.mubr.msk.f32.vlgmr.msra.gmra.mrb[0].mxu0 %vm272_vm1, %v1944_v25 }
  0x76   : > { %3208 = vmatpush3.msk.msra.mxu0 %vm327_vm0, %v3732_v4  ;;  %3053 = vmatprep.mubr.msk.f32.mxu1 %vm272_vm1, %v710_v26  ;;  %v1211_v4 = vld [vmem:[%s3552_s10 + $0x8b] sm:$0xff] }
  0x77   : > { %3183 = vmatprep.mubr.msk.f32.mxu0 %vm272_vm1, %v1945_v27 }
  0x79   : > { %3054 = vmatmul.mubr.msk.f32.gmra.mrb[12].mxu1 %vm272_vm1, %v711_v28  ;;  %3184 = vmatmul.mubr.msk.f32.gmra.mrb[2].mxu0 %vm272_vm1, %v1946_v29 }
  0x7a   : > { %3056 = vmatprep.mubr.msk.f32.mxu1 %vm272_vm1, %v712_v30  ;;  %3186 = vmatprep.mubr.msk.f32.mxu0 %vm272_vm1, %v1947_v31 }
  0x7d   : > { %3057 = vmatmul.mubr.msk.f32.gmra.mrb[14].mxu1 %vm272_vm1, %v713_v32  ;;  %3187 = vmatmul.mubr.msk.f32.gmra.mrb[4].mxu0 %vm272_vm1, %v1948_v33 }
  0x7e   : > { %3059 = vmatprep.mubr.msk.f32.mxu1 %vm272_vm1, %v714_v34  ;;  %3189 = vmatprep.mubr.msk.f32.mxu0 %vm272_vm1, %v1949_v35 }
  0x81   : > { %3060 = vmatmul.mubr.msk.f32.gmra.mrb[16].mxu1 %vm272_vm1, %v715_v36  ;;  %3190 = vmatmul.mubr.msk.f32.gmra.mrb[6].mxu0 %vm272_vm1, %v1950_v37 }
  0x82   : > { %3064 = vmatprep.mubr.msk.f32.mxu1 %vm272_vm1, %v3770_v12  ;;  %3192 = vmatprep.mubr.msk.f32.mxu0 %vm272_vm1, %v1951_v38 }
  0x85   : > { %3065 = vmatmul.mubr.msk.f32.vlgmr.msra.gmra.mrb[0].mxu1 %vm272_vm1, %v3778_v13  ;;  %3193 = vmatmul.mubr.msk.f32.gmra.mrb[8].mxu0 %vm272_vm1, %v1952_v39 }
  0x86   : > { %3067 = vmatprep.mubr.msk.f32.mxu1 %vm272_vm1, %v3783_v14  ;;  %3195 = vmatprep.mubr.msk.f32.mxu0 %vm272_vm1, %v1953_v40 }
  0x87   : > { %3237 = vmatpush3.msk.msra.mxu1 %vm327_vm0, %v3524_v0  ;;  %v1958_v0 = vld [vmem:[%s3552_s10 + $0x9d] sm:$0xff]  ;;  %s3967_s10 = scalar_lea.vmem %s4039_s4, %s2628_s9 }
  0x89   : > { %3068 = vmatmul.mubr.msk.f32.gmra.mrb[2].mxu1 %vm272_vm1, %v703_v15  ;;  %3196 = vmatmul.mubr.msk.f32.gmra.mrb[10].mxu0 %vm272_vm1, %v1954_v41 }
  0x8a   : > { %3070 = vmatprep.mubr.msk.f32.mxu1 %vm272_vm1, %v3795_v16  ;;  %3198 = vmatprep.mubr.msk.f32.mxu0 %vm272_vm1, %v1955_v42 }
  0x8d   : > { %3071 = vmatmul.mubr.msk.f32.gmra.mrb[4].mxu1 %vm272_vm1, %v705_v17  ;;  %3199 = vmatmul.mubr.msk.f32.gmra.mrb[12].mxu0 %vm272_vm1, %v1956_v43 }
  0x8e   : > { %3073 = vmatprep.mubr.msk.f32.mxu1 %vm272_vm1, %v3804_v18  ;;  %3201 = vmatprep.mubr.msk.f32.mxu0 %vm272_vm1, %v1957_v44 }
  0x91   : > { %3074 = vmatmul.mubr.msk.f32.gmra.mrb[6].mxu1 %vm272_vm1, %v707_v20  ;;  %3202 = vmatmul.mubr.msk.f32.gmra.mrb[14].mxu0 %vm272_vm1, %v1958_v0 }
  0x92   : > { %3076 = vmatprep.mubr.msk.f32.mxu1 %vm272_vm1, %v708_v22  ;;  %3204 = vmatprep.mubr.msk.f32.mxu0 %vm272_vm1, %v1959_v45 }
  0x95   : > { %3077 = vmatmul.mubr.msk.f32.gmra.mrb[8].mxu1 %vm272_vm1, %v709_v24  ;;  %3205 = vmatmul.mubr.msk.f32.gmra.mrb[16].mxu0 %vm272_vm1, %v1960_v46 }
  0x96   : > { %3079 = vmatprep.mubr.msk.f32.mxu1 %vm272_vm1, %v710_v26  ;;  %3209 = vmatprep.mubr.msk.f32.mxu0 %vm272_vm1, %v2192_v47  ;;  %v3959_v26 = vld [vmem:[%s4038_s3] ss:$0 sm:$0xff] }
  0x99   : > { %3080 = vmatmul.mubr.msk.f32.gmra.mrb[10].mxu1 %vm272_vm1, %v711_v28  ;;  %3210 = vmatmul.mubr.msk.f32.vlgmr.msra.gmra.mrb[0].mxu0 %vm272_vm1, %v2193_v48 }
  0x9a   : > { %3082 = vmatprep.mubr.msk.f32.mxu1 %vm272_vm1, %v712_v30  ;;  %3212 = vmatprep.mubr.msk.f32.mxu0 %vm272_vm1, %v2194_v49 }
  0x9d   : > { %3083 = vmatmul.mubr.msk.f32.gmra.mrb[12].mxu1 %vm272_vm1, %v713_v32  ;;  %3213 = vmatmul.mubr.msk.f32.gmra.mrb[2].mxu0 %vm272_vm1, %v2195_v50 }
  0x9e   : > { %3085 = vmatprep.mubr.msk.f32.mxu1 %vm272_vm1, %v714_v34  ;;  %3215 = vmatprep.mubr.msk.f32.mxu0 %vm272_vm1, %v2196_v51 }
  0xa1   : > { %3086 = vmatmul.mubr.msk.f32.gmra.mrb[14].mxu1 %vm272_vm1, %v715_v36  ;;  %3216 = vmatmul.mubr.msk.f32.gmra.mrb[4].mxu0 %vm272_vm1, %v2197_v52 }
  0xa2   : > { %3088 = vmatprep.mubr.msk.f32.mxu1 %vm272_vm1, %v963_v53  ;;  %3218 = vmatprep.mubr.msk.f32.mxu0 %vm272_vm1, %v2198_v54 }
  0xa5   : > { %3089 = vmatmul.mubr.msk.f32.gmra.mrb[16].mxu1 %vm272_vm1, %v964_v55  ;;  %3219 = vmatmul.mubr.msk.f32.gmra.mrb[6].mxu0 %vm272_vm1, %v2199_v56 }
  0xa6   : > { %3108 = vmatprep.mubr.msk.f32.mxu1 %vm272_vm1, %v1206_v57  ;;  %3221 = vmatprep.mubr.msk.f32.mxu0 %vm272_vm1, %v2200_v58 }
  0xa9   : > { %3109 = vmatmul.mubr.msk.f32.vlgmr.msra.gmra.mrb[10].mxu1 %vm272_vm1, %v1207_v59  ;;  %3222 = vmatmul.mubr.msk.f32.gmra.mrb[8].mxu0 %vm272_vm1, %v2201_v60 }
  0xaa   : > { %3111 = vmatprep.mubr.msk.f32.mxu1 %vm272_vm1, %v1208_v61  ;;  %3224 = vmatprep.mubr.msk.f32.mxu0 %vm272_vm1, %v2202_v62 }
  0xad   : > { %3112 = vmatmul.mubr.msk.f32.gmra.mrb[12].mxu1 %vm272_vm1, %v1209_v63  ;;  %3225 = vmatmul.mubr.msk.f32.gmra.mrb[10].mxu0 %vm272_vm1, %v2203_v1 }
  0xae   : > { %3114 = vmatprep.mubr.msk.f32.mxu1 %vm272_vm1, %v1210_v2  ;;  %3227 = vmatprep.mubr.msk.f32.mxu0 %vm272_vm1, %v2204_v3 }
  0xb1   : > { %3115 = vmatmul.mubr.msk.f32.gmra.mrb[14].mxu1 %vm272_vm1, %v1211_v4  ;;  %3228 = vmatmul.mubr.msk.f32.gmra.mrb[12].mxu0 %vm272_vm1, %v2205_v5 }
  0xb2   : > { %3117 = vmatprep.mubr.msk.f32.mxu1 %vm272_vm1, %v1212_v6  ;;  %3230 = vmatprep.mubr.msk.f32.mxu0 %vm272_vm1, %v2206_v7 }
  0xb5   : > { %3118 = vmatmul.mubr.msk.f32.gmra.mrb[16].mxu1 %vm272_vm1, %v1213_v8  ;;  %3231 = vmatmul.mubr.msk.f32.gmra.mrb[14].mxu0 %vm272_vm1, %v2207_v9 }
  0xb6   : > { %3233 = vmatprep.mubr.msk.f32.mxu0 %vm272_vm1, %v2208_v10 }
  0xb9   : > { %3234 = vmatmul.mubr.msk.f32.gmra.mrb[16].mxu0 %vm272_vm1, %v2209_v11 }
 0x158   : > { %v3066_v12 = vpop.f32.mrb[0].mxu1 }
 0x159   : > { %v1089_v13 = vpop.f32.mrb[1].mxu1 }
 0x15c   : > { %v3069_v14 = vpop.f32.mrb[2].mxu1 }
 0x15d   : > { %v1099_v15 = vpop.f32.mrb[3].mxu1 }
 0x160   : > { %v3072_v16 = vpop.f32.mrb[4].mxu1 }
 0x161   : > { %v1109_v17 = vpop.f32.mrb[5].mxu1 }
 0x164   : > { %v3075_v18 = vpop.f32.mrb[6].mxu1 }
 0x165   : > { %v1119_v19 = vpop.f32.mrb[7].mxu1 }
 0x168   : > { %v3078_v20 = vpop.f32.mrb[8].mxu1 }
 0x169   : > { %v1129_v21 = vpop.f32.mrb[9].mxu1 }
 0x16c   : > { %v3211_v22 = vpop.f32.mrb[0].mxu0 }
 0x16d   : > { %v3238_v24 = vadd.f32 %v3211_v22, %v3066_v12  ;;  %v2334_v25 = vpop.f32.mrb[1].mxu0 }
 0x16e   : > { %v3239_v27 = vadd.f32 %v2334_v25, %v1089_v13 }
 0x16f   : > { %v2449_v28 = vmul.f32 %v3238_v24, %v3954_v23 }
 0x170   : > { %v2448_v29 = vmul.f32 %v3239_v27, %v3954_v23  ;;  %v3214_v30 = vpop.f32.mrb[2].mxu0 }
 0x171   : > { %v2474_v31 = vadd.f32 %v3959_v26, %v2449_v28  ;;  %v3240_v32 = vadd.f32 %v3214_v30, %v3069_v14  ;;  %v2344_v33 = vpop.f32.mrb[3].mxu0 }
 0x172   : > { %v2473_v34 = vadd.f32 %v3959_v26, %v2448_v29  ;;  %v3241_v35 = vadd.f32 %v2344_v33, %v1099_v15 }
 0x173   : > { %v2492_v36 = vmax.f32 %v2474_v31, 0.0  ;;  %v2451_v37 = vmul.f32 %v3240_v32, %v3954_v23 }
 0x174   : > { %v2491_v38 = vmax.f32 %v2473_v34, 0.0  ;;  %v2450_v39 = vmul.f32 %v3241_v35, %v3954_v23  ;;  %v3217_v40 = vpop.f32.mrb[4].mxu0 }
 0x175   : > { %2510 = vst [vmem:[%s3967_s10 + $0x8] sm:$0xff] %v2492_v36  ;;  %v2476_v41 = vadd.f32 %v3959_v26, %v2451_v37  ;;  %v3242_v42 = vadd.f32 %v3217_v40, %v3072_v16  ;;  %v2354_v43 = vpop.f32.mrb[5].mxu0 }
 0x176   : > { %2509 = vst [vmem:[%s3967_s10] sm:$0xff] %v2491_v38  ;;  %v2475_v44 = vadd.f32 %v3959_v26, %v2450_v39  ;;  %v3243_v0 = vadd.f32 %v2354_v43, %v1109_v17 }
 0x177   : > { %v2494_v45 = vmax.f32 %v2476_v41, 0.0  ;;  %v2453_v46 = vmul.f32 %v3242_v42, %v3954_v23 }
 0x178   : > { %v2493_v47 = vmax.f32 %v2475_v44, 0.0  ;;  %v2452_v48 = vmul.f32 %v3243_v0, %v3954_v23  ;;  %v3220_v49 = vpop.f32.mrb[6].mxu0 }
 0x179   : > { %2512 = vst [vmem:[%s3967_s10 + $0x18] sm:$0xff] %v2494_v45  ;;  %v2478_v50 = vadd.f32 %v3959_v26, %v2453_v46  ;;  %v3244_v51 = vadd.f32 %v3220_v49, %v3075_v18  ;;  %v2364_v52 = vpop.f32.mrb[7].mxu0 }
 0x17a   : > { %2511 = vst [vmem:[%s3967_s10 + $0x10] sm:$0xff] %v2493_v47  ;;  %v2477_v53 = vadd.f32 %v3959_v26, %v2452_v48  ;;  %v3245_v54 = vadd.f32 %v2364_v52, %v1119_v19 }
 0x17b   : > { %v2496_v55 = vmax.f32 %v2478_v50, 0.0  ;;  %v2455_v56 = vmul.f32 %v3244_v51, %v3954_v23 }
 0x17c   : > { %v2495_v57 = vmax.f32 %v2477_v53, 0.0  ;;  %v2454_v58 = vmul.f32 %v3245_v54, %v3954_v23  ;;  %v3110_v59 = vpop.f32.mrb[10].mxu1  ;;  %v3223_v60 = vpop.f32.mrb[8].mxu0 }
 0x17d   : > { %2514 = vst [vmem:[%s3967_s10 + $0x28] sm:$0xff] %v2496_v55  ;;  %v2480_v61 = vadd.f32 %v3959_v26, %v2455_v56  ;;  %v3246_v62 = vadd.f32 %v3223_v60, %v3078_v20  ;;  %v1388_v63 = vpop.f32.mrb[11].mxu1  ;;  %v2374_v1 = vpop.f32.mrb[9].mxu0 }
 0x17e   : > { %2513 = vst [vmem:[%s3967_s10 + $0x20] sm:$0xff] %v2495_v57  ;;  %v2479_v2 = vadd.f32 %v3959_v26, %v2454_v58  ;;  %v3247_v3 = vadd.f32 %v2374_v1, %v1129_v21 }
 0x17f   : > { %v2498_v4 = vmax.f32 %v2480_v61, 0.0  ;;  %v2457_v5 = vmul.f32 %v3246_v62, %v3954_v23 }
 0x180   : > { %v2497_v6 = vmax.f32 %v2479_v2, 0.0  ;;  %v2456_v7 = vmul.f32 %v3247_v3, %v3954_v23  ;;  %v3113_v8 = vpop.f32.mrb[12].mxu1  ;;  %v3226_v9 = vpop.f32.mrb[10].mxu0 }
 0x181   : > { %2516 = vst [vmem:[%s3967_s10 + $0x38] sm:$0xff] %v2498_v4  ;;  %v2482_v10 = vadd.f32 %v3959_v26, %v2457_v5  ;;  %v3248_v11 = vadd.f32 %v3226_v9, %v3110_v59  ;;  %v1398_v12 = vpop.f32.mrb[13].mxu1  ;;  %v2384_v13 = vpop.f32.mrb[11].mxu0 }
 0x182   : > { %2515 = vst [vmem:[%s3967_s10 + $0x30] sm:$0xff] %v2497_v6  ;;  %v2481_v14 = vadd.f32 %v3959_v26, %v2456_v7  ;;  %v3249_v15 = vadd.f32 %v2384_v13, %v1388_v63 }
 0x183   : > { %v2500_v16 = vmax.f32 %v2482_v10, 0.0  ;;  %v2459_v17 = vmul.f32 %v3248_v11, %v3954_v23 }
 0x184   : > { %v2499_v18 = vmax.f32 %v2481_v14, 0.0  ;;  %v2458_v19 = vmul.f32 %v3249_v15, %v3954_v23  ;;  %v3116_v20 = vpop.f32.mrb[14].mxu1  ;;  %v3229_v21 = vpop.f32.mrb[12].mxu0 }
 0x185   : > { %2518 = vst [vmem:[%s3967_s10 + $0x48] sm:$0xff] %v2500_v16  ;;  %v2484_v22 = vadd.f32 %v3959_v26, %v2459_v17  ;;  %v3250_v24 = vadd.f32 %v3229_v21, %v3113_v8  ;;  %v1408_v25 = vpop.f32.mrb[15].mxu1  ;;  %v2394_v27 = vpop.f32.mrb[13].mxu0 }
 0x186   : > { %2517 = vst [vmem:[%s3967_s10 + $0x40] sm:$0xff] %v2499_v18  ;;  %v2483_v28 = vadd.f32 %v3959_v26, %v2458_v19  ;;  %v3251_v29 = vadd.f32 %v2394_v27, %v1398_v12 }
 0x187   : > { %v2502_v30 = vmax.f32 %v2484_v22, 0.0  ;;  %v2461_v31 = vmul.f32 %v3250_v24, %v3954_v23 }
 0x188   : > { %v2501_v32 = vmax.f32 %v2483_v28, 0.0  ;;  %v2460_v33 = vmul.f32 %v3251_v29, %v3954_v23  ;;  %v3119_v34 = vpop.f32.mrb[16].mxu1  ;;  %v3232_v35 = vpop.f32.mrb[14].mxu0 }
 0x189   : > { %2520 = vst [vmem:[%s3967_s10 + $0x58] sm:$0xff] %v2502_v30  ;;  %v2486_v36 = vadd.f32 %v3959_v26, %v2461_v31  ;;  %v3252_v37 = vadd.f32 %v3232_v35, %v3116_v20  ;;  %v1418_v38 = vpop.f32.mrb[17].mxu1  ;;  %v2404_v39 = vpop.f32.mrb[15].mxu0 }
 0x18a   : > { %2519 = vst [vmem:[%s3967_s10 + $0x50] sm:$0xff] %v2501_v32  ;;  %v2485_v40 = vadd.f32 %v3959_v26, %v2460_v33  ;;  %v3253_v41 = vadd.f32 %v2404_v39, %v1408_v25 }
 0x18b   : > { %v2504_v42 = vmax.f32 %v2486_v36, 0.0  ;;  %v2463_v43 = vmul.f32 %v3252_v37, %v3954_v23 }
 0x18c   : > { %v2503_v44 = vmax.f32 %v2485_v40, 0.0  ;;  %v2462_v0 = vmul.f32 %v3253_v41, %v3954_v23  ;;  %v3235_v45 = vpop.f32.mrb[16].mxu0 }
 0x18d   : > { %2522 = vst [vmem:[%s3967_s10 + $0x68] sm:$0xff] %v2504_v42  ;;  %v2488_v46 = vadd.f32 %v3959_v26, %v2463_v43  ;;  %v3254_v47 = vadd.f32 %v3235_v45, %v3119_v34  ;;  %v2414_v48 = vpop.f32.mrb[17].mxu0 }
 0x18e   : > { %2521 = vst [vmem:[%s3967_s10 + $0x60] sm:$0xff] %v2503_v44  ;;  %v2487_v49 = vadd.f32 %v3959_v26, %v2462_v0  ;;  %v3255_v50 = vadd.f32 %v2414_v48, %v1418_v38 }
 0x18f   : > { %v2506_v51 = vmax.f32 %v2488_v46, 0.0  ;;  %v2465_v52 = vmul.f32 %v3254_v47, %v3954_v23 }
 0x190   : > { %v2505_v53 = vmax.f32 %v2487_v49, 0.0  ;;  %v2464_v54 = vmul.f32 %v3255_v50, %v3954_v23 }
 0x191   : > { %2524 = vst [vmem:[%s3967_s10 + $0x78] sm:$0xff] %v2506_v51  ;;  %v2490_v55 = vadd.f32 %v3959_v26, %v2465_v52 }
 0x192   : > { %2523 = vst [vmem:[%s3967_s10 + $0x70] sm:$0xff] %v2505_v53  ;;  %v2489_v56 = vadd.f32 %v3959_v26, %v2464_v54 }
 0x193   : > { %v2508_v57 = vmax.f32 %v2490_v55, 0.0 }
 0x194   : > { %v2507_v58 = vmax.f32 %v2489_v56, 0.0 }
 0x195   : > { %2526 = vst [vmem:[%s3967_s10 + $0x88] sm:$0xff] %v2508_v57 }
 0x196   : > { %2525 = vst [vmem:[%s3967_s10 + $0x80] sm:$0xff] %v2507_v58 }
 0x197 PF: > { %s14_s19 = sadd.s32 1, %s3464_s19   ;;  %s4040_s15 = smov %s3456_s17 }
 0x198   : > { %p11_p7 = scmp.ge.s32.totalorder %s14_s19, 6   ;;  %s4041_s16 = smov %s3460_s18 }
 0x199   : > { %s4042_s17 = smov %s4045_s20  ;;  %s4043_s18 = smov %s4049_s21 }
 0x19a   :  { %13 = sbr.rel (!%p11_p7) target bundleno = 3 (0x3), region = 66 }

// kernel: _input_conv_block_impl.2
= control target key start
LH: loop header
LB: loop body
LE: loop exit
PB: predicated region body
PF: predicated region fallthrough
CT: control target
= control target key end

     0   :  { %s3576_s12 = smov 0   ;;  %s3578_s13 = smov 0   ;;  %s4140_s0 = inlined_call_operand.vmem [shape: f32[2,2,182,4], index: 0, kind: input, shape index: {}]   ;;  %s4141_s1 = inlined_call_operand.vmem [shape: f32[36,128], index: 1, kind: input, shape index: {}]   ;;  %s4142_s2 = inlined_call_operand.vmem [shape: f32[144,1], index: 2, kind: input, shape index: {}]   ;;  %s4143_s3 = inlined_call_operand.vmem [shape: f32[2,2,2,128], index: 3, kind: output, shape index: {}]  }
   0x1   :  { %s3580_s14 = smov 0   ;;  %s3582_s15 = smov 0  }
   0x2   :  { %s3584_s16 = smov 0  }
   0x3 LB: > { %s22_s17 = sadd.s32 1, %s3545_s14  ;;  %s25_s18 = sadd.s32 1, %s3549_s15  ;;  %s3553_s16 = sphi %s3584_s16, %s13_s16   ;;  %s3549_s15 = sphi %s3582_s15, %s4147_s15   ;;  %s3545_s14 = sphi %s3580_s14, %s4146_s14   ;;  %s3541_s13 = sphi %s3578_s13, %s4145_s13   ;;  %s3537_s12 = sphi %s3576_s12, %s4144_s12  }
   0x4   : > { %p23_p0 = scmp.ge.s32.totalorder %s22_s17, 2  ;;  %p2715_p1 = scmp.ge.s32.totalorder %s3553_s16, 1 }
   0x5   : > { %p157_p2 = scmp.lt.s32.totalorder %s3553_s16, 5 }
   0x6   : > { %s4149_s17 = smov (%p23_p0, %s22_s17), 0  ;;  %s4151_s18 = smov (!%p23_p0, %s25_s18), %s3549_s15 }
   0x7   : > { %p158_p3 = pnand %p2715_p1, %p157_p2  ;;  %p27_p4 = scmp.ge.s32.totalorder %s4151_s18, 2 }
   0x8   : > { %vm298_vm0 = vcmask (!%p158_p3), 1043456   ;;  %v3609_v0 = vld [vmem:[%s4141_s1 + $0x10] sm:$0xf] (!%p158_p3)  ;;  %v242_v1 = vld [vmem:[%s4141_s1 + $0x4] sm:$0xf] (!%p158_p3)  ;;  %p188_p5 = scmp.lt.s32.totalorder (!%p158_p3), %s3541_s13, 1 }
   0x9   : > { %s4153_s18 = smov (%p27_p4, %s4151_s18), 0  ;;  %161 = sbr.rel (%p158_p3) target bundleno = 421 (0x1a5), region = 32 }
   0xa   : > { %3179 = vmatprep.subr.msk.mxu0 (!%p158_p3), %vm298_vm0, %v3609_v0  ;;  %3063 = vmatprep.subr.msk.mxu1 (!%p158_p3), %vm298_vm0, %v242_v1  ;;  %p190_p6 = scmp.lt.s32.totalorder (!%p158_p3), %s3537_s12, 1  ;;  %v1434_v2 = vld [vmem:[%s4141_s1 + $0x14] sm:$0xf] (!%p158_p3)  ;;  %v223_v3 = vld [vmem:[%s4141_s1] sm:$0xf] (!%p158_p3)  ;;  %vm243_vm1 = vcmask (!%p158_p3), 31744  }
   0xb   : > { %3180 = vmatpush3.msk.msra.mxu0 (!%p158_p3), %vm298_vm0, %v3609_v0  ;;  %3064 = vmatpush3.msk.msra.mxu1 (!%p158_p3), %vm298_vm0, %v242_v1  ;;  %v1683_v10 = vld [vmem:[%s4141_s1 + $0x18] sm:$0xf] (!%p158_p3)  ;;  %v3655_v11 = vld [vmem:[%s4141_s1 + $0x8] sm:$0xf] (!%p158_p3)  ;;  %v3705_v32 = vld [vmem:[%s4141_s1 + $0x1c] sm:$0xf] (!%p158_p3) }
   0xc   : > { %3208 = vmatprep.subr.msk.mxu0 (!%p158_p3), %vm298_vm0, %v1434_v2  ;;  %3092 = vmatprep.subr.msk.mxu1 (!%p158_p3), %vm298_vm0, %v223_v3  ;;  %v3555_v49 = vmov (!%p158_p3), 0   ;;  %v3771_v50 = vld [vmem:[%s4141_s1 + $0xc] sm:$0xf] (!%p158_p3)  ;;  %v2412_v57 = vld [vmem:[%s4142_s2] sm:$0xff] (!%p158_p3)  ;;  %v2414_v58 = vld [vmem:[%s4142_s2 + $0x10] sm:$0xff] (!%p158_p3) }
   0xd   : > { %3513 = vset.pattern.permute.xlu0 (!%p158_p3), %v3555_v49  ;;  %3514 = vset.pattern.permute.xlu1 (!%p158_p3), %v3555_v49  ;;  %v2413_v61 = vld [vmem:[%s4142_s2 + $0x8] sm:$0xff] (!%p158_p3)  ;;  %v2415_v62 = vld [vmem:[%s4142_s2 + $0x18] sm:$0xff] (!%p158_p3) }
   0xe   : > { %2432 = vperm.xlu0 (!%p158_p3), %3513, %v2412_v57   ;;  %2442 = vperm.xlu1 (!%p158_p3), %3514, %v2414_v58  }
  0x10   : > { %s4155_s13 = smov (!%p188_p5, %s3541_s13), 1  ;;  %s4157_s12 = smov (!%p190_p6, %s3537_s12), 1 }
  0x11   : > { %s3471_s27 = smul.u32 46, %s4155_s13 }
  0x12   : > { %s3470_s28 = smul.u32 23, %s4157_s12  ;;  %2437 = vperm.xlu0 %3513, %v2413_v61   ;;  %2447 = vperm.xlu1 %3514, %v2415_v62  }
  0x14   : > { %s194_s29 = sadd.s32 %s3471_s27, %s3470_s28 }
  0x15   : > { %s2716_s30 = sshll.u32 %s194_s29, 3 }
  0x16   : > { %s3637_s6 = scalar_lea.vmem %s4140_s0, %s2716_s30 }
  0x17   : > { %v224_v4 = vld [vmem:[%s3637_s6 + $0x1] sm:$0xff]  ;;  %v1167_v5 = vld [vmem:[%s3637_s6 + $0x13] sm:$0xff]  ;;  %v225_v6 = vld [vmem:[%s3637_s6 + $0x9] sm:$0xff] }
  0x18   : > { %3065 = vmatprep.mubr.msk.f32.mxu1 %vm243_vm1, %v224_v4  ;;  %3181 = vmatprep.mubr.msk.f32.mxu0 %vm243_vm1, %v1167_v5  ;;  %v1168_v7 = vld [vmem:[%s3637_s6 + $0x1b] sm:$0xff]  ;;  %v226_v8 = vld [vmem:[%s3637_s6 + $0x11] sm:$0xff]  ;;  %v1169_v9 = vld [vmem:[%s3637_s6 + $0x23] sm:$0xff] }
  0x19   : > { %3066 = vmatmul.mubr.msk.f32.vlgmr.msra.gmra.mrb[0].mxu1 %vm243_vm1, %v225_v6  ;;  %3182 = vmatmul.mubr.msk.f32.vlgmr.msra.gmra.mrb[0].mxu0 %vm243_vm1, %v1168_v7  ;;  %v227_v12 = vld [vmem:[%s3637_s6 + $0x19] sm:$0xff]  ;;  %v1170_v13 = vld [vmem:[%s3637_s6 + $0x2b] sm:$0xff]  ;;  %v228_v14 = vld [vmem:[%s3637_s6 + $0x21] sm:$0xff] }
  0x1a   : > { %3209 = vmatpush3.msk.msra.mxu0 %vm298_vm0, %v1434_v2  ;;  %3068 = vmatprep.mubr.msk.f32.mxu1 %vm243_vm1, %v226_v8  ;;  %v1171_v15 = vld [vmem:[%s3637_s6 + $0x33] sm:$0xff]  ;;  %v229_v16 = vld [vmem:[%s3637_s6 + $0x29] sm:$0xff]  ;;  %v1172_v17 = vld [vmem:[%s3637_s6 + $0x3b] sm:$0xff] }
  0x1b   : > { %3184 = vmatprep.mubr.msk.f32.mxu0 %vm243_vm1, %v1169_v9  ;;  %3093 = vmatpush3.msk.msra.mxu1 %vm298_vm0, %v223_v3  ;;  %v230_v18 = vld [vmem:[%s3637_s6 + $0x31] sm:$0xff]  ;;  %v1173_v19 = vld [vmem:[%s3637_s6 + $0x43] sm:$0xff]  ;;  %v231_v20 = vld [vmem:[%s3637_s6 + $0x39] sm:$0xff] }
  0x1c   : > { %3237 = vmatprep.subr.msk.mxu0 %vm298_vm0, %v1683_v10  ;;  %3121 = vmatprep.subr.msk.mxu1 %vm298_vm0, %v3655_v11  ;;  %v1174_v21 = vld [vmem:[%s3637_s6 + $0x4b] sm:$0xff]  ;;  %v232_v22 = vld [vmem:[%s3637_s6 + $0x41] sm:$0xff]  ;;  %v1175_v23 = vld [vmem:[%s3637_s6 + $0x53] sm:$0xff] }
  0x1d   : > { %3069 = vmatmul.mubr.msk.f32.gmra.mrb[2].mxu1 %vm243_vm1, %v227_v12  ;;  %3185 = vmatmul.mubr.msk.f32.gmra.mrb[2].mxu0 %vm243_vm1, %v1170_v13  ;;  %v233_v24 = vld [vmem:[%s3637_s6 + $0x49] sm:$0xff]  ;;  %v1176_v25 = vld [vmem:[%s3637_s6 + $0x5b] sm:$0xff]  ;;  %v234_v26 = vld [vmem:[%s3637_s6 + $0x51] sm:$0xff] }
  0x1e   : > { %3071 = vmatprep.mubr.msk.f32.mxu1 %vm243_vm1, %v228_v14  ;;  %3187 = vmatprep.mubr.msk.f32.mxu0 %vm243_vm1, %v1171_v15  ;;  %v1416_v27 = vld [vmem:[%s3637_s6 + $0x14] sm:$0xff]  ;;  %v1417_v29 = vld [vmem:[%s3637_s6 + $0x1c] sm:$0xff]  ;;  %v3700_v31 = vld [vmem:[%s3637_s6 + $0x24] sm:$0xff] }
  0x1f   : > { %v235_v28 = vld [vmem:[%s3637_s6 + $0x59] sm:$0xff]  ;;  %v236_v30 = vld [vmem:[%s3637_s6 + $0x61] sm:$0xff]  ;;  %v237_v33 = vld [vmem:[%s3637_s6 + $0x69] sm:$0xff] }
  0x20   : > { %v3713_v34 = vld [vmem:[%s3637_s6 + $0x2c] sm:$0xff]  ;;  %v3719_v36 = vld [vmem:[%s3637_s6 + $0x34] sm:$0xff]  ;;  %v3731_v38 = vld [vmem:[%s3637_s6 + $0x3c] sm:$0xff] }
  0x21   : > { %3072 = vmatmul.mubr.msk.f32.gmra.mrb[4].mxu1 %vm243_vm1, %v229_v16  ;;  %3188 = vmatmul.mubr.msk.f32.gmra.mrb[4].mxu0 %vm243_vm1, %v1172_v17  ;;  %v238_v35 = vld [vmem:[%s3637_s6 + $0x71] sm:$0xff]  ;;  %v239_v37 = vld [vmem:[%s3637_s6 + $0x79] sm:$0xff]  ;;  %v240_v39 = vld [vmem:[%s3637_s6 + $0x81] sm:$0xff] }
  0x22   : > { %3074 = vmatprep.mubr.msk.f32.mxu1 %vm243_vm1, %v230_v18  ;;  %3190 = vmatprep.mubr.msk.f32.mxu0 %vm243_vm1, %v1173_v19  ;;  %v3735_v40 = vld [vmem:[%s3637_s6 + $0x44] sm:$0xff]  ;;  %v3745_v42 = vld [vmem:[%s3637_s6 + $0x4c] sm:$0xff]  ;;  %v3749_v44 = vld [vmem:[%s3637_s6 + $0x54] sm:$0xff] }
  0x23   : > { %v241_v41 = vld [vmem:[%s3637_s6 + $0x89] sm:$0xff]  ;;  %v205_v43 = vld [vmem:[%s3637_s6] sm:$0xff]  ;;  %v208_v51 = vld [vmem:[%s3637_s6 + $0x18] sm:$0xff] }
  0x24   : > { %v206_v45 = vld [vmem:[%s3637_s6 + $0x8] sm:$0xff]  ;;  %v3759_v46 = vld [vmem:[%s3637_s6 + $0x5c] sm:$0xff]  ;;  %v207_v47 = vld [vmem:[%s3637_s6 + $0x10] sm:$0xff] }
  0x25   : > { %3075 = vmatmul.mubr.msk.f32.gmra.mrb[6].mxu1 %vm243_vm1, %v231_v20  ;;  %3191 = vmatmul.mubr.msk.f32.gmra.mrb[6].mxu0 %vm243_vm1, %v1174_v21  ;;  %v3763_v48 = vld [vmem:[%s3637_s6 + $0x64] sm:$0xff]  ;;  %v3778_v52 = vld [vmem:[%s3637_s6 + $0x6c] sm:$0xff]  ;;  %v3784_v54 = vld [vmem:[%s3637_s6 + $0x74] sm:$0xff] }
  0x26   : > { %3077 = vmatprep.mubr.msk.f32.mxu1 %vm243_vm1, %v232_v22  ;;  %3193 = vmatprep.mubr.msk.f32.mxu0 %vm243_vm1, %v1175_v23  ;;  %v209_v53 = vld [vmem:[%s3637_s6 + $0x20] sm:$0xff]  ;;  %v210_v55 = vld [vmem:[%s3637_s6 + $0x28] sm:$0xff]  ;;  %v211_v59 = vld [vmem:[%s3637_s6 + $0x30] sm:$0xff] }
  0x27   : > { %v3796_v56 = vld [vmem:[%s3637_s6 + $0x7c] sm:$0xff]  ;;  %v3806_v60 = vld [vmem:[%s3637_s6 + $0x84] sm:$0xff]  ;;  %v3822_v1 = vld [vmem:[%s3637_s6 + $0x8c] sm:$0xff] }
  0x28   : > { %v212_v63 = vld [vmem:[%s3637_s6 + $0x38] sm:$0xff]  ;;  %v213_v2 = vld [vmem:[%s3637_s6 + $0x40] sm:$0xff]  ;;  %v2417_v5 = vld [vmem:[%s4142_s2 + $0x28] sm:$0xff] }
  0x29   : > { %3078 = vmatmul.mubr.msk.f32.gmra.mrb[8].mxu1 %vm243_vm1, %v233_v24  ;;  %3194 = vmatmul.mubr.msk.f32.gmra.mrb[8].mxu0 %vm243_vm1, %v1176_v25  ;;  %v3826_v3 = vld [vmem:[%s3637_s6 + $0x94] sm:$0xff]  ;;  %v2416_v4 = vld [vmem:[%s4142_s2 + $0x20] sm:$0xff]  ;;  %v214_v6 = vld [vmem:[%s3637_s6 + $0x48] sm:$0xff] }
  0x2a   : > { %3080 = vmatprep.mubr.msk.f32.mxu1 %vm243_vm1, %v234_v26  ;;  %3210 = vmatprep.mubr.msk.f32.mxu0 %vm243_vm1, %v1416_v27  ;;  %v3842_v7 = vld [vmem:[%s3637_s6 + $0x9c] sm:$0xff]  ;;  %v215_v8 = vld [vmem:[%s3637_s6 + $0x50] sm:$0xff]  ;;  %v2421_v15 = vld [vmem:[%s4142_s2 + $0x48] sm:$0xff] }
  0x2b   : > { %2452 = vperm.xlu0 %3513, %v2416_v4   ;;  %2457 = vperm.xlu1 %3514, %v2417_v5   ;;  %v2418_v9 = vld [vmem:[%s4142_s2 + $0x30] sm:$0xff]  ;;  %v217_v12 = vld [vmem:[%s3637_s6 + $0x60] sm:$0xff]  ;;  %v218_v16 = vld [vmem:[%s3637_s6 + $0x68] sm:$0xff] }
  0x2c   : > { %v3862_v13 = vld [vmem:[%s4141_s1 + $0x20] sm:$0xf]  ;;  %v219_v17 = vld [vmem:[%s3637_s6 + $0x70] sm:$0xff]  ;;  %v2423_v19 = vld [vmem:[%s4142_s2 + $0x58] sm:$0xff] }
  0x2d   : > { %3081 = vmatmul.mubr.msk.f32.gmra.mrb[10].mxu1 %vm243_vm1, %v235_v28  ;;  %3211 = vmatmul.mubr.msk.f32.vlgmr.msra.gmra.mrb[0].mxu0 %vm243_vm1, %v1417_v29  ;;  %v2420_v14 = vld [vmem:[%s4142_s2 + $0x40] sm:$0xff]  ;;  %v2422_v18 = vld [vmem:[%s4142_s2 + $0x50] sm:$0xff]  ;;  %v220_v20 = vld [vmem:[%s3637_s6 + $0x78] sm:$0xff] }
  0x2e   : > { %3238 = vmatpush3.msk.msra.mxu0 %vm298_vm0, %v1683_v10  ;;  %3083 = vmatprep.mubr.msk.f32.mxu1 %vm243_vm1, %v236_v30  ;;  %v2419_v10 = vld [vmem:[%s4142_s2 + $0x38] sm:$0xff]  ;;  %v221_v21 = vld [vmem:[%s3637_s6 + $0x80] sm:$0xff]  ;;  %v2425_v23 = vld [vmem:[%s4142_s2 + $0x68] sm:$0xff] }
  0x2f   : > { %3213 = vmatprep.mubr.msk.f32.mxu0 %vm243_vm1, %v3700_v31  ;;  %3266 = vmatprep.subr.msk.mxu0 %vm298_vm0, %v3705_v32  ;;  %v2424_v22 = vld [vmem:[%s4142_s2 + $0x60] sm:$0xff]  ;;  %v222_v24 = vld [vmem:[%s3637_s6 + $0x88] sm:$0xff]  ;;  %v2426_v26 = vld [vmem:[%s4142_s2 + $0x70] sm:$0xff] }
  0x30   : > { %2462 = vperm.xlu0 %3513, %v2418_v9   ;;  %2467 = vperm.xlu1 %3514, %v2419_v10   ;;  %v669_v25 = vld [vmem:[%s3637_s6 + $0x2] sm:$0xff]  ;;  %v2427_v27 = vld [vmem:[%s4142_s2 + $0x78] sm:$0xff]  ;;  %v670_v28 = vld [vmem:[%s3637_s6 + $0xa] sm:$0xff] }
  0x31   : > { %3084 = vmatmul.mubr.msk.f32.gmra.mrb[12].mxu1 %vm243_vm1, %v237_v33  ;;  %3214 = vmatmul.mubr.msk.f32.gmra.mrb[2].mxu0 %vm243_vm1, %v3713_v34  ;;  %v3924_v29 = vld [vmem:[%s3637_s6 + $0x12] sm:$0xff]  ;;  %v2428_v30 = vld [vmem:[%s4142_s2 + $0x80] sm:$0xff]  ;;  %v2429_v33 = vld [vmem:[%s4142_s2 + $0x88] sm:$0xff] }
  0x32   : > { %3086 = vmatprep.mubr.msk.f32.mxu1 %vm243_vm1, %v238_v35  ;;  %3216 = vmatprep.mubr.msk.f32.mxu0 %vm243_vm1, %v3719_v36  ;;  %v3961_v35 = vld [vmem:[%s3637_s6 + $0x32] sm:$0xff]  ;;  %v1922_v57 = vld [vmem:[%s3637_s6 + $0x65] sm:$0xff] }
  0x33   : > { %v683_v49 = vld [vmem:[%s3637_s6 + $0x72] sm:$0xff]  ;;  %v1926_v61 = vld [vmem:[%s3637_s6 + $0x85] sm:$0xff] }
  0x34   : > { %2472 = vperm.xlu0 %3513, %v2420_v14   ;;  %2477 = vperm.xlu1 %3514, %v2421_v15   ;;  %v1923_v58 = vld [vmem:[%s3637_s6 + $0x6d] sm:$0xff]  ;;  %v2165_v5 = vld [vmem:[%s3637_s6 + $0x36] sm:$0xff] }
  0x35   : > { %3087 = vmatmul.mubr.msk.f32.gmra.mrb[14].mxu1 %vm243_vm1, %v239_v37  ;;  %3217 = vmatmul.mubr.msk.f32.gmra.mrb[4].mxu0 %vm243_vm1, %v3731_v38  ;;  %v3973_v37 = vld [vmem:[%s3637_s6 + $0x42] sm:$0xff]  ;;  %v1927_v62 = vld [vmem:[%s3637_s6 + $0x8d] sm:$0xff]  ;;  %v2169_v10 = vld [vmem:[%s3637_s6 + $0x56] sm:$0xff] }
  0x36   : > { %3089 = vmatprep.mubr.msk.f32.mxu1 %vm243_vm1, %v240_v39  ;;  %3219 = vmatprep.mubr.msk.f32.mxu0 %vm243_vm1, %v3735_v40  ;;  %v678_v39 = vld [vmem:[%s3637_s6 + $0x4a] sm:$0xff]  ;;  %v934_v9 = vld [vmem:[%s3637_s6 + $0x92] sm:$0xff] }
  0x37   : > { %v2164_v4 = vld [vmem:[%s3637_s6 + $0x2e] sm:$0xff]  ;;  %v2171_v14 = vld [vmem:[%s3637_s6 + $0x66] sm:$0xff] }
  0x38   : > { %2482 = vperm.xlu0 %3513, %v2422_v18   ;;  %2487 = vperm.xlu1 %3514, %v2423_v19   ;;  %v1178_v15 = vld [vmem:[%s3637_s6 + $0x6b] sm:$0xff]  ;;  %v2173_v18 = vld [vmem:[%s3637_s6 + $0x76] sm:$0xff] }
  0x39   : > { %3090 = vmatmul.mubr.msk.f32.gmra.mrb[16].mxu1 %vm243_vm1, %v241_v41  ;;  %3220 = vmatmul.mubr.msk.f32.gmra.mrb[6].mxu0 %vm243_vm1, %v3745_v42  ;;  %v679_v41 = vld [vmem:[%s3637_s6 + $0x52] sm:$0xff]  ;;  %v1180_v19 = vld [vmem:[%s3637_s6 + $0x7b] sm:$0xff] }
  0x3a   : > { %3094 = vmatprep.mubr.msk.f32.mxu1 %vm243_vm1, %v205_v43  ;;  %3222 = vmatprep.mubr.msk.f32.mxu0 %vm243_vm1, %v3749_v44  ;;  %v680_v43 = vld [vmem:[%s3637_s6 + $0x5a] sm:$0xff] }
  0x3c   : > { %2492 = vperm.xlu0 %3513, %v2424_v22   ;;  %2497 = vperm.xlu1 %3514, %v2425_v23   ;;  %v2175_v22 = vld [vmem:[%s3637_s6 + $0x86] sm:$0xff] }
  0x3d   : > { %3095 = vmatmul.mubr.msk.f32.vlgmr.msra.gmra.mrb[0].mxu1 %vm243_vm1, %v206_v45  ;;  %3223 = vmatmul.mubr.msk.f32.gmra.mrb[8].mxu0 %vm243_vm1, %v3759_v46  ;;  %v681_v45 = vld [vmem:[%s3637_s6 + $0x62] sm:$0xff]  ;;  %v1182_v23 = vld [vmem:[%s3637_s6 + $0x8b] sm:$0xff] }
  0x3e   : > { %3097 = vmatprep.mubr.msk.f32.mxu1 %vm243_vm1, %v207_v47  ;;  %3225 = vmatprep.mubr.msk.f32.mxu0 %vm243_vm1, %v3763_v48  ;;  %v682_v47 = vld [vmem:[%s3637_s6 + $0x6a] sm:$0xff] }
  0x3f   : > { %3122 = vmatpush3.msk.msra.mxu1 %vm298_vm0, %v3655_v11  ;;  %v216_v11 = vld [vmem:[%s3637_s6 + $0x58] sm:$0xff] }
  0x40   : > { %3150 = vmatprep.subr.msk.mxu1 %vm298_vm0, %v3771_v50  ;;  %2502 = vperm.xlu0 %3513, %v2426_v26   ;;  %v2177_v26 = vld [vmem:[%s3637_s6 + $0x96] sm:$0xff] }
  0x41   : > { %3098 = vmatmul.mubr.msk.f32.gmra.mrb[2].mxu1 %vm243_vm1, %v208_v51  ;;  %3226 = vmatmul.mubr.msk.f32.gmra.mrb[10].mxu0 %vm243_vm1, %v3778_v52  ;;  %v684_v51 = vld [vmem:[%s3637_s6 + $0x7a] sm:$0xff] }
  0x42   : > { %3100 = vmatprep.mubr.msk.f32.mxu1 %vm243_vm1, %v209_v53  ;;  %3228 = vmatprep.mubr.msk.f32.mxu0 %vm243_vm1, %v3784_v54  ;;  %v685_v53 = vld [vmem:[%s3637_s6 + $0x82] sm:$0xff] }
  0x43   : > { %2507 = vperm.xlu1 %3514, %v2427_v27   ;;  %v1184_v27 = vld [vmem:[%s3637_s6 + $0x9b] sm:$0xff] }
  0x44   : > { %2512 = vperm.xlu0 %3513, %v2428_v30   ;;  %v2180_v30 = vld [vmem:[%s3637_s6 + $0xae] sm:$0xff] }
  0x45   : > { %3101 = vmatmul.mubr.msk.f32.gmra.mrb[4].mxu1 %vm243_vm1, %v210_v55  ;;  %3229 = vmatmul.mubr.msk.f32.gmra.mrb[12].mxu0 %vm243_vm1, %v3796_v56  ;;  %v686_v55 = vld [vmem:[%s3637_s6 + $0x8a] sm:$0xff] }
  0x46   : > { %3103 = vmatprep.mubr.msk.f32.mxu1 %vm243_vm1, %v211_v59  ;;  %3231 = vmatprep.mubr.msk.f32.mxu0 %vm243_vm1, %v3806_v60  ;;  %v1924_v59 = vld [vmem:[%s3637_s6 + $0x75] sm:$0xff] }
  0x47   : > { %2517 = vperm.xlu1 %3514, %v2429_v33  }
  0x49   : > { %3104 = vmatmul.mubr.msk.f32.gmra.mrb[6].mxu1 %vm243_vm1, %v212_v63  ;;  %3232 = vmatmul.mubr.msk.f32.gmra.mrb[14].mxu0 %vm243_vm1, %v3822_v1  ;;  %v1928_v63 = vld [vmem:[%s3637_s6 + $0x95] sm:$0xff] }
  0x4a   : > { %3106 = vmatprep.mubr.msk.f32.mxu1 %vm243_vm1, %v213_v2  ;;  %3234 = vmatprep.mubr.msk.f32.mxu0 %vm243_vm1, %v3826_v3  ;;  %v1931_v2 = vld [vmem:[%s3637_s6 + $0xad] sm:$0xff] }
  0x4d   : > { %3107 = vmatmul.mubr.msk.f32.gmra.mrb[8].mxu1 %vm243_vm1, %v214_v6  ;;  %3235 = vmatmul.mubr.msk.f32.gmra.mrb[16].mxu0 %vm243_vm1, %v3842_v7  ;;  %v2166_v6 = vld [vmem:[%s3637_s6 + $0x3e] sm:$0xff] }
  0x4e   : > { %3109 = vmatprep.mubr.msk.f32.mxu1 %vm243_vm1, %v215_v8  ;;  %3239 = vmatprep.mubr.msk.f32.mxu0 %vm243_vm1, %v3700_v31  ;;  %v3937_v31 = vld [vmem:[%s3637_s6 + $0x1a] sm:$0xff]  ;;  %v2168_v8 = vld [vmem:[%s3637_s6 + $0x4e] sm:$0xff] }
  0x51   : > { %3110 = vmatmul.mubr.msk.f32.gmra.mrb[10].mxu1 %vm243_vm1, %v216_v11  ;;  %3240 = vmatmul.mubr.msk.f32.vlgmr.msra.gmra.mrb[0].mxu0 %vm243_vm1, %v3713_v34  ;;  %v3958_v34 = vld [vmem:[%s3637_s6 + $0x2a] sm:$0xff]  ;;  %v935_v11 = vld [vmem:[%s3637_s6 + $0x9a] sm:$0xff] }
  0x52   : > { %3267 = vmatpush3.msk.msra.mxu0 %vm298_vm0, %v3705_v32  ;;  %3112 = vmatprep.mubr.msk.f32.mxu1 %vm243_vm1, %v217_v12  ;;  %v3942_v32 = vld [vmem:[%s3637_s6 + $0x22] sm:$0xff] }
  0x53   : > { %3242 = vmatprep.mubr.msk.f32.mxu0 %vm243_vm1, %v3719_v36  ;;  %3295 = vmatprep.subr.msk.mxu0 %vm298_vm0, %v3862_v13  ;;  %v676_v36 = vld [vmem:[%s3637_s6 + $0x3a] sm:$0xff] }
  0x54   : > { %v2170_v12 = vld [vmem:[%s3637_s6 + $0x5e] sm:$0xff] }
  0x55   : > { %3113 = vmatmul.mubr.msk.f32.gmra.mrb[12].mxu1 %vm243_vm1, %v218_v16  ;;  %3243 = vmatmul.mubr.msk.f32.gmra.mrb[2].mxu0 %vm243_vm1, %v3731_v38  ;;  %v1681_v38 = vld [vmem:[%s3637_s6 + $0xa4] sm:$0xff]  ;;  %v2172_v16 = vld [vmem:[%s3637_s6 + $0x6e] sm:$0xff] }
  0x56   : > { %3115 = vmatprep.mubr.msk.f32.mxu1 %vm243_vm1, %v219_v17  ;;  %3245 = vmatprep.mubr.msk.f32.mxu0 %vm243_vm1, %v3735_v40  ;;  %v1682_v40 = vld [vmem:[%s3637_s6 + $0xac] sm:$0xff] }
  0x57   : > { %v1179_v17 = vld [vmem:[%s3637_s6 + $0x73] sm:$0xff] }
  0x59   : > { %3116 = vmatmul.mubr.msk.f32.gmra.mrb[14].mxu1 %vm243_vm1, %v220_v20  ;;  %3246 = vmatmul.mubr.msk.f32.gmra.mrb[4].mxu0 %vm243_vm1, %v3745_v42  ;;  %v1914_v42 = vld [vmem:[%s3637_s6 + $0x25] sm:$0xff] }
  0x5a   : > { %3118 = vmatprep.mubr.msk.f32.mxu1 %vm243_vm1, %v221_v21  ;;  %3248 = vmatprep.mubr.msk.f32.mxu0 %vm243_vm1, %v3749_v44  ;;  %v1915_v44 = vld [vmem:[%s3637_s6 + $0x2d] sm:$0xff]  ;;  %v2174_v20 = vld [vmem:[%s3637_s6 + $0x7e] sm:$0xff] }
  0x5b   : > { %v1181_v21 = vld [vmem:[%s3637_s6 + $0x83] sm:$0xff] }
  0x5d   : > { %3119 = vmatmul.mubr.msk.f32.gmra.mrb[16].mxu1 %vm243_vm1, %v222_v24  ;;  %3249 = vmatmul.mubr.msk.f32.gmra.mrb[6].mxu0 %vm243_vm1, %v3759_v46  ;;  %v1916_v46 = vld [vmem:[%s3637_s6 + $0x35] sm:$0xff] }
  0x5e   : > { %3123 = vmatprep.mubr.msk.f32.mxu1 %vm243_vm1, %v669_v25  ;;  %3251 = vmatprep.mubr.msk.f32.mxu0 %vm243_vm1, %v3763_v48  ;;  %v1917_v48 = vld [vmem:[%s3637_s6 + $0x3d] sm:$0xff]  ;;  %v2176_v24 = vld [vmem:[%s3637_s6 + $0x8e] sm:$0xff] }
  0x5f   : > { %v1183_v25 = vld [vmem:[%s3637_s6 + $0x93] sm:$0xff] }
  0x61   : > { %3124 = vmatmul.mubr.msk.f32.vlgmr.msra.gmra.mrb[0].mxu1 %vm243_vm1, %v670_v28  ;;  %3252 = vmatmul.mubr.msk.f32.gmra.mrb[8].mxu0 %vm243_vm1, %v3778_v52  ;;  %v1919_v52 = vld [vmem:[%s3637_s6 + $0x4d] sm:$0xff]  ;;  %v2178_v28 = vld [vmem:[%s3637_s6 + $0x9e] sm:$0xff] }
  0x62   : > { %3126 = vmatprep.mubr.msk.f32.mxu1 %vm243_vm1, %v3924_v29  ;;  %3254 = vmatprep.mubr.msk.f32.mxu0 %vm243_vm1, %v3784_v54  ;;  %v1920_v54 = vld [vmem:[%s3637_s6 + $0x55] sm:$0xff] }
  0x63   : > { %3151 = vmatpush3.msk.msra.mxu1 %vm298_vm0, %v3771_v50  ;;  %v1918_v50 = vld [vmem:[%s3637_s6 + $0x45] sm:$0xff] }
  0x64   : > { %3324 = vmatprep.subr.msk.mxu1 %vm298_vm0, %v3609_v0 }
  0x65   : > { %3127 = vmatmul.mubr.msk.f32.gmra.mrb[2].mxu1 %vm243_vm1, %v3937_v31  ;;  %3255 = vmatmul.mubr.msk.f32.gmra.mrb[10].mxu0 %vm243_vm1, %v3796_v56  ;;  %v1921_v56 = vld [vmem:[%s3637_s6 + $0x5d] sm:$0xff] }
  0x66   : > { %3129 = vmatprep.mubr.msk.f32.mxu1 %vm243_vm1, %v3942_v32  ;;  %3257 = vmatprep.mubr.msk.f32.mxu0 %vm243_vm1, %v3806_v60  ;;  %v1925_v60 = vld [vmem:[%s3637_s6 + $0x7d] sm:$0xff] }
  0x69   : > { %3130 = vmatmul.mubr.msk.f32.gmra.mrb[4].mxu1 %vm243_vm1, %v3958_v34  ;;  %3258 = vmatmul.mubr.msk.f32.gmra.mrb[12].mxu0 %vm243_vm1, %v3822_v1  ;;  %v1930_v1 = vld [vmem:[%s3637_s6 + $0xa5] sm:$0xff] }
  0x6a   : > { %3132 = vmatprep.mubr.msk.f32.mxu1 %vm243_vm1, %v3961_v35  ;;  %3260 = vmatprep.mubr.msk.f32.mxu0 %vm243_vm1, %v3826_v3  ;;  %v2163_v3 = vld [vmem:[%s3637_s6 + $0x26] sm:$0xff] }
  0x6d   : > { %3133 = vmatmul.mubr.msk.f32.gmra.mrb[6].mxu1 %vm243_vm1, %v676_v36  ;;  %3261 = vmatmul.mubr.msk.f32.gmra.mrb[14].mxu0 %vm243_vm1, %v3842_v7  ;;  %v2167_v7 = vld [vmem:[%s3637_s6 + $0x46] sm:$0xff] }
  0x6e   : > { %3135 = vmatprep.mubr.msk.f32.mxu1 %vm243_vm1, %v3973_v37  ;;  %3263 = vmatprep.mubr.msk.f32.mxu0 %vm243_vm1, %v1681_v38 }
  0x71   : > { %3136 = vmatmul.mubr.msk.f32.gmra.mrb[8].mxu1 %vm243_vm1, %v678_v39  ;;  %3264 = vmatmul.mubr.msk.f32.gmra.mrb[16].mxu0 %vm243_vm1, %v1682_v40 }
  0x72   : > { %3138 = vmatprep.mubr.msk.f32.mxu1 %vm243_vm1, %v679_v41  ;;  %3268 = vmatprep.mubr.msk.f32.mxu0 %vm243_vm1, %v1914_v42 }
  0x75   : > { %3139 = vmatmul.mubr.msk.f32.gmra.mrb[10].mxu1 %vm243_vm1, %v680_v43  ;;  %3269 = vmatmul.mubr.msk.f32.vlgmr.msra.gmra.mrb[0].mxu0 %vm243_vm1, %v1915_v44 }
  0x76   : > { %3296 = vmatpush3.msk.msra.mxu0 %vm298_vm0, %v3862_v13  ;;  %3141 = vmatprep.mubr.msk.f32.mxu1 %vm243_vm1, %v681_v45  ;;  %v1177_v13 = vld [vmem:[%s3637_s6 + $0x63] sm:$0xff] }
  0x77   : > { %3271 = vmatprep.mubr.msk.f32.mxu0 %vm243_vm1, %v1916_v46 }
  0x79   : > { %3142 = vmatmul.mubr.msk.f32.gmra.mrb[12].mxu1 %vm243_vm1, %v682_v47  ;;  %3272 = vmatmul.mubr.msk.f32.gmra.mrb[2].mxu0 %vm243_vm1, %v1917_v48 }
  0x7a   : > { %3144 = vmatprep.mubr.msk.f32.mxu1 %vm243_vm1, %v683_v49  ;;  %3274 = vmatprep.mubr.msk.f32.mxu0 %vm243_vm1, %v1918_v50 }
  0x7d   : > { %3145 = vmatmul.mubr.msk.f32.gmra.mrb[14].mxu1 %vm243_vm1, %v684_v51  ;;  %3275 = vmatmul.mubr.msk.f32.gmra.mrb[4].mxu0 %vm243_vm1, %v1919_v52 }
  0x7e   : > { %3147 = vmatprep.mubr.msk.f32.mxu1 %vm243_vm1, %v685_v53  ;;  %3277 = vmatprep.mubr.msk.f32.mxu0 %vm243_vm1, %v1920_v54 }
  0x81   : > { %3148 = vmatmul.mubr.msk.f32.gmra.mrb[16].mxu1 %vm243_vm1, %v686_v55  ;;  %3278 = vmatmul.mubr.msk.f32.gmra.mrb[6].mxu0 %vm243_vm1, %v1921_v56 }
  0x82   : > { %3152 = vmatprep.mubr.msk.f32.mxu1 %vm243_vm1, %v3924_v29  ;;  %3280 = vmatprep.mubr.msk.f32.mxu0 %vm243_vm1, %v1922_v57  ;;  %v2179_v29 = vld [vmem:[%s3637_s6 + $0xa6] sm:$0xff] }
  0x85   : > { %3153 = vmatmul.mubr.msk.f32.vlgmr.msra.gmra.mrb[0].mxu1 %vm243_vm1, %v3937_v31  ;;  %3281 = vmatmul.mubr.msk.f32.gmra.mrb[8].mxu0 %vm243_vm1, %v1923_v58 }
  0x86   : > { %3155 = vmatprep.mubr.msk.f32.mxu1 %vm243_vm1, %v3942_v32  ;;  %3283 = vmatprep.mubr.msk.f32.mxu0 %vm243_vm1, %v1924_v59 }
  0x87   : > { %3325 = vmatpush3.msk.msra.mxu1 %vm298_vm0, %v3609_v0  ;;  %v1929_v0 = vld [vmem:[%s3637_s6 + $0x9d] sm:$0xff]  ;;  %s2717_s6 = sshll.u32 %s4155_s13, 1 }
  0x88   : > { %s202_s22 = sadd.s32 %s2717_s6, %s4157_s12 }
  0x89   : > { %3156 = vmatmul.mubr.msk.f32.gmra.mrb[2].mxu1 %vm243_vm1, %v3958_v34  ;;  %3284 = vmatmul.mubr.msk.f32.gmra.mrb[10].mxu0 %vm243_vm1, %v1925_v60  ;;  %s2718_s23 = sshll.u32 %s202_s22, 1 }
  0x8a   : > { %3158 = vmatprep.mubr.msk.f32.mxu1 %vm243_vm1, %v3961_v35  ;;  %3286 = vmatprep.mubr.msk.f32.mxu0 %vm243_vm1, %v1926_v61  ;;  %s204_s26 = scalar_lea.vmem %s4143_s3, %s2718_s23 }
  0x8d   : > { %3159 = vmatmul.mubr.msk.f32.gmra.mrb[4].mxu1 %vm243_vm1, %v676_v36  ;;  %3287 = vmatmul.mubr.msk.f32.gmra.mrb[12].mxu0 %vm243_vm1, %v1927_v62  ;;  %v2433_v33 = vpop.permute.xlu0 %2432  ;;  %v2443_v35 = vpop.permute.xlu1 %2442 }
  0x8e   : > { %3161 = vmatprep.mubr.msk.f32.mxu1 %vm243_vm1, %v3973_v37  ;;  %3289 = vmatprep.mubr.msk.f32.mxu0 %vm243_vm1, %v1928_v63 }
  0x91   : > { %3162 = vmatmul.mubr.msk.f32.gmra.mrb[6].mxu1 %vm243_vm1, %v678_v39  ;;  %3290 = vmatmul.mubr.msk.f32.gmra.mrb[14].mxu0 %vm243_vm1, %v1929_v0  ;;  %v2438_v38 = vpop.permute.xlu0 %2437  ;;  %v2448_v40 = vpop.permute.xlu1 %2447 }
  0x92   : > { %3164 = vmatprep.mubr.msk.f32.mxu1 %vm243_vm1, %v679_v41  ;;  %3292 = vmatprep.mubr.msk.f32.mxu0 %vm243_vm1, %v1930_v1 }
  0x95   : > { %3165 = vmatmul.mubr.msk.f32.gmra.mrb[8].mxu1 %vm243_vm1, %v680_v43  ;;  %3293 = vmatmul.mubr.msk.f32.gmra.mrb[16].mxu0 %vm243_vm1, %v1931_v2 }
  0x96   : > { %3167 = vmatprep.mubr.msk.f32.mxu1 %vm243_vm1, %v681_v45  ;;  %3297 = vmatprep.mubr.msk.f32.mxu0 %vm243_vm1, %v2163_v3 }
  0x99   : > { %3168 = vmatmul.mubr.msk.f32.gmra.mrb[10].mxu1 %vm243_vm1, %v682_v47  ;;  %3298 = vmatmul.mubr.msk.f32.vlgmr.msra.gmra.mrb[0].mxu0 %vm243_vm1, %v2164_v4 }
  0x9a   : > { %3170 = vmatprep.mubr.msk.f32.mxu1 %vm243_vm1, %v683_v49  ;;  %3300 = vmatprep.mubr.msk.f32.mxu0 %vm243_vm1, %v2165_v5 }
  0x9d   : > { %3171 = vmatmul.mubr.msk.f32.gmra.mrb[12].mxu1 %vm243_vm1, %v684_v51  ;;  %3301 = vmatmul.mubr.msk.f32.gmra.mrb[2].mxu0 %vm243_vm1, %v2166_v6 }
  0x9e   : > { %3173 = vmatprep.mubr.msk.f32.mxu1 %vm243_vm1, %v685_v53  ;;  %3303 = vmatprep.mubr.msk.f32.mxu0 %vm243_vm1, %v2167_v7 }
  0xa1   : > { %3174 = vmatmul.mubr.msk.f32.gmra.mrb[14].mxu1 %vm243_vm1, %v686_v55  ;;  %3304 = vmatmul.mubr.msk.f32.gmra.mrb[4].mxu0 %vm243_vm1, %v2168_v8 }
  0xa2   : > { %3176 = vmatprep.mubr.msk.f32.mxu1 %vm243_vm1, %v934_v9  ;;  %3306 = vmatprep.mubr.msk.f32.mxu0 %vm243_vm1, %v2169_v10 }
  0xa5   : > { %3177 = vmatmul.mubr.msk.f32.gmra.mrb[16].mxu1 %vm243_vm1, %v935_v11  ;;  %3307 = vmatmul.mubr.msk.f32.gmra.mrb[6].mxu0 %vm243_vm1, %v2170_v12 }
  0xa6   : > { %3196 = vmatprep.mubr.msk.f32.mxu1 %vm243_vm1, %v1177_v13  ;;  %3309 = vmatprep.mubr.msk.f32.mxu0 %vm243_vm1, %v2171_v14 }
  0xa9   : > { %3197 = vmatmul.mubr.msk.f32.vlgmr.msra.gmra.mrb[10].mxu1 %vm243_vm1, %v1178_v15  ;;  %3310 = vmatmul.mubr.msk.f32.gmra.mrb[8].mxu0 %vm243_vm1, %v2172_v16 }
  0xaa   : > { %3199 = vmatprep.mubr.msk.f32.mxu1 %vm243_vm1, %v1179_v17  ;;  %3312 = vmatprep.mubr.msk.f32.mxu0 %vm243_vm1, %v2173_v18  ;;  %v2453_v43 = vpop.permute.xlu0 %2452  ;;  %v2458_v45 = vpop.permute.xlu1 %2457 }
  0xad   : > { %3200 = vmatmul.mubr.msk.f32.gmra.mrb[12].mxu1 %vm243_vm1, %v1180_v19  ;;  %3313 = vmatmul.mubr.msk.f32.gmra.mrb[10].mxu0 %vm243_vm1, %v2174_v20 }
  0xae   : > { %3202 = vmatprep.mubr.msk.f32.mxu1 %vm243_vm1, %v1181_v21  ;;  %3315 = vmatprep.mubr.msk.f32.mxu0 %vm243_vm1, %v2175_v22 }
  0xaf   : > { %v2463_v48 = vpop.permute.xlu0 %2462  ;;  %v2468_v52 = vpop.permute.xlu1 %2467 }
  0xb1   : > { %3203 = vmatmul.mubr.msk.f32.gmra.mrb[14].mxu1 %vm243_vm1, %v1182_v23  ;;  %3316 = vmatmul.mubr.msk.f32.gmra.mrb[12].mxu0 %vm243_vm1, %v2176_v24 }
  0xb2   : > { %3205 = vmatprep.mubr.msk.f32.mxu1 %vm243_vm1, %v1183_v25  ;;  %3318 = vmatprep.mubr.msk.f32.mxu0 %vm243_vm1, %v2177_v26 }
  0xb3   : > { %v2473_v0 = vpop.permute.xlu0 %2472  ;;  %v2478_v6 = vpop.permute.xlu1 %2477 }
  0xb5   : > { %3206 = vmatmul.mubr.msk.f32.gmra.mrb[16].mxu1 %vm243_vm1, %v1184_v27  ;;  %3319 = vmatmul.mubr.msk.f32.gmra.mrb[14].mxu0 %vm243_vm1, %v2178_v28 }
  0xb6   : > { %3321 = vmatprep.mubr.msk.f32.mxu0 %vm243_vm1, %v2179_v29 }
  0xb7   : > { %v2483_v20 = vpop.permute.xlu0 %2482  ;;  %v2488_v28 = vpop.permute.xlu1 %2487 }
  0xb9   : > { %3322 = vmatmul.mubr.msk.f32.gmra.mrb[16].mxu0 %vm243_vm1, %v2180_v30 }
 0x158   : > { %v3154_v31 = vpop.f32.mrb[0].mxu1 }
 0x159   : > { %v1060_v32 = vpop.f32.mrb[1].mxu1 }
 0x15c   : > { %v3157_v34 = vpop.f32.mrb[2].mxu1 }
 0x15d   : > { %v1070_v36 = vpop.f32.mrb[3].mxu1 }
 0x160   : > { %v3160_v37 = vpop.f32.mrb[4].mxu1 }
 0x161   : > { %v1080_v39 = vpop.f32.mrb[5].mxu1 }
 0x164   : > { %v3163_v41 = vpop.f32.mrb[6].mxu1 }
 0x165   : > { %v1090_v42 = vpop.f32.mrb[7].mxu1 }
 0x168   : > { %v3166_v44 = vpop.f32.mrb[8].mxu1 }
 0x169   : > { %v1100_v46 = vpop.f32.mrb[9].mxu1 }
 0x16c   : > { %v3299_v47 = vpop.f32.mrb[0].mxu0 }
 0x16d   : > { %v3326_v49 = vadd.f32 %v3299_v47, %v3154_v31  ;;  %v2305_v50 = vpop.f32.mrb[1].mxu0 }
 0x16e   : > { %v3327_v51 = vadd.f32 %v2305_v50, %v1060_v32 }
 0x16f   : > { %v2521_v53 = vmul.f32 %v3326_v49, %v2438_v38  ;;  %v2563_v54 = vmul.f32 %v3326_v49, %v3326_v49 }
 0x170   : > { %v2520_v55 = vmul.f32 %v3327_v51, %v2433_v33  ;;  %v2562_v56 = vmul.f32 %v3327_v51, %v3327_v51  ;;  %v3302_v57 = vpop.f32.mrb[2].mxu0 }
 0x171   : > { %v2581_v58 = vmul.f32 %v2563_v54, %v2438_v38  ;;  %v3328_v59 = vadd.f32 %v3302_v57, %v3157_v34  ;;  %v2315_v60 = vpop.f32.mrb[3].mxu0 }
 0x172   : > { %v2538_v61 = vadd.f32 %v2521_v53, %v2520_v55  ;;  %v2580_v62 = vmul.f32 %v2562_v56, %v2433_v33  ;;  %v3329_v63 = vadd.f32 %v2315_v60, %v1070_v36 }
 0x173   : > { %v2565_v1 = vmul.f32 %v3328_v59, %v3328_v59  ;;  %v2523_v9 = vmul.f32 %v3328_v59, %v2448_v40 }
 0x174   : > { %v2598_v2 = vadd.f32 %v2581_v58, %v2580_v62  ;;  %v2522_v3 = vmul.f32 %v3329_v63, %v2443_v35  ;;  %v2564_v4 = vmul.f32 %v3329_v63, %v3329_v63  ;;  %v3305_v5 = vpop.f32.mrb[4].mxu0 }
 0x175   : > { %v3330_v7 = vadd.f32 %v3305_v5, %v3160_v37  ;;  %v2325_v8 = vpop.f32.mrb[5].mxu0  ;;  %v2583_v13 = vmul.f32 %v2565_v1, %v2448_v40 }
 0x176   : > { %v2539_v10 = vadd.f32 %v2538_v61, %v2522_v3  ;;  %v2582_v11 = vmul.f32 %v2564_v4, %v2443_v35  ;;  %v3331_v12 = vadd.f32 %v2325_v8, %v1080_v39 }
 0x177   : > { %v2567_v14 = vmul.f32 %v3330_v7, %v3330_v7  ;;  %v2525_v21 = vmul.f32 %v3330_v7, %v2458_v45 }
 0x178   : > { %v2599_v15 = vadd.f32 %v2598_v2, %v2582_v11  ;;  %v2524_v16 = vmul.f32 %v3331_v12, %v2453_v43  ;;  %v2540_v17 = vadd.f32 %v2539_v10, %v2523_v9  ;;  %v2566_v18 = vmul.f32 %v3331_v12, %v3331_v12  ;;  %v3308_v19 = vpop.f32.mrb[6].mxu0 }
 0x179   : > { %v3332_v22 = vadd.f32 %v3308_v19, %v3163_v41  ;;  %v2335_v23 = vpop.f32.mrb[7].mxu0  ;;  %v2585_v29 = vmul.f32 %v2567_v14, %v2458_v45 }
 0x17a   : > { %v2541_v24 = vadd.f32 %v2540_v17, %v2524_v16  ;;  %v2584_v25 = vmul.f32 %v2566_v18, %v2453_v43  ;;  %v2600_v26 = vadd.f32 %v2599_v15, %v2583_v13  ;;  %v3333_v27 = vadd.f32 %v2335_v23, %v1090_v42  ;;  %v2493_v43 = vpop.permute.xlu0 %2492 }
 0x17b   : > { %v2569_v30 = vmul.f32 %v3332_v22, %v3332_v22  ;;  %v2527_v37 = vmul.f32 %v3332_v22, %v2468_v52 }
 0x17c   : > { %v2601_v31 = vadd.f32 %v2600_v26, %v2584_v25  ;;  %v2526_v32 = vmul.f32 %v3333_v27, %v2463_v48  ;;  %v2542_v33 = vadd.f32 %v2541_v24, %v2525_v21  ;;  %v2568_v34 = vmul.f32 %v3333_v27, %v3333_v27  ;;  %v3198_v35 = vpop.f32.mrb[10].mxu1  ;;  %v3311_v36 = vpop.f32.mrb[8].mxu0 }
 0x17d   : > { %v3334_v38 = vadd.f32 %v3311_v36, %v3166_v44  ;;  %v1359_v39 = vpop.f32.mrb[11].mxu1  ;;  %v2345_v40 = vpop.f32.mrb[9].mxu0  ;;  %v2587_v51 = vmul.f32 %v2569_v30, %v2468_v52 }
 0x17e   : > { %v2543_v47 = vadd.f32 %v2542_v33, %v2526_v32  ;;  %v2586_v41 = vmul.f32 %v2568_v34, %v2463_v48  ;;  %v2602_v49 = vadd.f32 %v2601_v31, %v2585_v29  ;;  %v3335_v50 = vadd.f32 %v2345_v40, %v1100_v46  ;;  %v2498_v48 = vpop.permute.xlu1 %2497 }
 0x17f   : > { %v2571_v42 = vmul.f32 %v3334_v38, %v3334_v38  ;;  %v2529_v58 = vmul.f32 %v3334_v38, %v2478_v6 }
 0x180   : > { %v2603_v53 = vadd.f32 %v2602_v49, %v2586_v41  ;;  %v2528_v45 = vmul.f32 %v3335_v50, %v2473_v0  ;;  %v2544_v54 = vadd.f32 %v2543_v47, %v2527_v37  ;;  %v2570_v55 = vmul.f32 %v3335_v50, %v3335_v50  ;;  %v3201_v56 = vpop.f32.mrb[12].mxu1  ;;  %v3314_v57 = vpop.f32.mrb[10].mxu0 }
 0x181   : > { %v3336_v59 = vadd.f32 %v3314_v57, %v3198_v35  ;;  %v1369_v60 = vpop.f32.mrb[13].mxu1  ;;  %v2355_v61 = vpop.f32.mrb[11].mxu0  ;;  %v2589_v2 = vmul.f32 %v2571_v42, %v2478_v6 }
 0x182   : > { %v2545_v44 = vadd.f32 %v2544_v54, %v2528_v45  ;;  %v2588_v62 = vmul.f32 %v2570_v55, %v2473_v0  ;;  %v2604_v63 = vadd.f32 %v2603_v53, %v2587_v51  ;;  %v3337_v1 = vadd.f32 %v2355_v61, %v1359_v39  ;;  %v2503_v0 = vpop.permute.xlu0 %2502 }
 0x183   : > { %v2573_v46 = vmul.f32 %v3336_v59, %v3336_v59  ;;  %v2531_v9 = vmul.f32 %v3336_v59, %v2488_v28 }
 0x184   : > { %v2605_v3 = vadd.f32 %v2604_v63, %v2588_v62  ;;  %v2530_v52 = vmul.f32 %v3337_v1, %v2483_v20  ;;  %v2546_v4 = vadd.f32 %v2545_v44, %v2529_v58  ;;  %v2572_v5 = vmul.f32 %v3337_v1, %v3337_v1  ;;  %v3204_v7 = vpop.f32.mrb[14].mxu1  ;;  %v3317_v8 = vpop.f32.mrb[12].mxu0 }
 0x185   : > { %v3338_v10 = vadd.f32 %v3317_v8, %v3201_v56  ;;  %v1379_v11 = vpop.f32.mrb[15].mxu1  ;;  %v2365_v12 = vpop.f32.mrb[13].mxu0  ;;  %v2591_v17 = vmul.f32 %v2573_v46, %v2488_v28 }
 0x186   : > { %v2547_v13 = vadd.f32 %v2546_v4, %v2530_v52  ;;  %v2590_v14 = vmul.f32 %v2572_v5, %v2483_v20  ;;  %v2606_v15 = vadd.f32 %v2605_v3, %v2589_v2  ;;  %v3339_v16 = vadd.f32 %v2365_v12, %v1369_v60  ;;  %v2508_v20 = vpop.permute.xlu1 %2507  ;;  %v2513_v53 = vpop.permute.xlu0 %2512 }
 0x187   : > { %v2575_v18 = vmul.f32 %v3338_v10, %v3338_v10  ;;  %v2533_v25 = vmul.f32 %v3338_v10, %v2498_v48 }
 0x188   : > { %v2607_v19 = vadd.f32 %v2606_v15, %v2590_v14  ;;  %v2532_v6 = vmul.f32 %v3339_v16, %v2493_v43  ;;  %v2548_v21 = vadd.f32 %v2547_v13, %v2531_v9  ;;  %v2574_v22 = vmul.f32 %v3339_v16, %v3339_v16  ;;  %v3207_v23 = vpop.f32.mrb[16].mxu1  ;;  %v3320_v24 = vpop.f32.mrb[14].mxu0 }
 0x189   : > { %v3340_v26 = vadd.f32 %v3320_v24, %v3204_v7  ;;  %v1389_v27 = vpop.f32.mrb[17].mxu1  ;;  %v2375_v29 = vpop.f32.mrb[15].mxu0  ;;  %v2593_v34 = vmul.f32 %v2575_v18, %v2498_v48 }
 0x18a   : > { %v2549_v30 = vadd.f32 %v2548_v21, %v2532_v6  ;;  %v2592_v31 = vmul.f32 %v2574_v22, %v2493_v43  ;;  %v2608_v32 = vadd.f32 %v2607_v19, %v2591_v17  ;;  %v3341_v33 = vadd.f32 %v2375_v29, %v1379_v11  ;;  %v2518_v58 = vpop.permute.xlu1 %2517 }
 0x18b   : > { %v2577_v35 = vmul.f32 %v3340_v26, %v3340_v26  ;;  %v2535_v40 = vmul.f32 %v3340_v26, %v2508_v20 }
 0x18c   : > { %v2609_v36 = vadd.f32 %v2608_v32, %v2592_v31  ;;  %v2534_v28 = vmul.f32 %v3341_v33, %v2503_v0  ;;  %v2550_v37 = vadd.f32 %v2549_v30, %v2533_v25  ;;  %v2576_v38 = vmul.f32 %v3341_v33, %v3341_v33  ;;  %v3323_v39 = vpop.f32.mrb[16].mxu0 }
 0x18d   : > { %v3342_v47 = vadd.f32 %v3323_v39, %v3207_v23  ;;  %v2385_v41 = vpop.f32.mrb[17].mxu0  ;;  %v2595_v43 = vmul.f32 %v2577_v35, %v2508_v20 }
 0x18e   : > { %v2551_v49 = vadd.f32 %v2550_v37, %v2534_v28  ;;  %v2594_v50 = vmul.f32 %v2576_v38, %v2503_v0  ;;  %v2610_v51 = vadd.f32 %v2609_v36, %v2593_v34  ;;  %v3343_v42 = vadd.f32 %v2385_v41, %v1389_v27 }
 0x18f   : > { %v2579_v45 = vmul.f32 %v3342_v47, %v3342_v47  ;;  %v2537_v59 = vmul.f32 %v3342_v47, %v2518_v58 }
 0x190   : > { %v2611_v54 = vadd.f32 %v2610_v51, %v2594_v50  ;;  %v2536_v55 = vmul.f32 %v3343_v42, %v2513_v53  ;;  %v2552_v56 = vadd.f32 %v2551_v49, %v2535_v40  ;;  %v2578_v57 = vmul.f32 %v3343_v42, %v3343_v42 }
 0x191   : > { %v2597_v62 = vmul.f32 %v2579_v45, %v2518_v58 }
 0x192   : > { %v2553_v60 = vadd.f32 %v2552_v56, %v2536_v55  ;;  %v2596_v61 = vmul.f32 %v2578_v57, %v2513_v53  ;;  %v2612_v44 = vadd.f32 %v2611_v54, %v2595_v43 }
 0x194   : > { %v2554_v63 = vadd.f32 %v2553_v60, %v2537_v59  ;;  %v2613_v1 = vadd.f32 %v2612_v44, %v2596_v61 }
 0x196   : > { %v2555_v48 = vrot.slane %v2554_v63, 4  ;;  %v2614_v2 = vadd.f32 %v2613_v1, %v2597_v62 }
 0x198   : > { %v2556_v46 = vadd.f32 %v2555_v48, %v2554_v63  ;;  %v2615_v3 = vrot.slane %v2614_v2, 4 }
 0x19a   : > { %v2557_v52 = vrot.slane %v2556_v46, 2  ;;  %v2616_v4 = vadd.f32 %v2615_v3, %v2614_v2 }
 0x19c   : > { %v2558_v5 = vadd.f32 %v2557_v52, %v2556_v46  ;;  %v2617_v7 = vrot.slane %v2616_v4, 2 }
 0x19e   : > { %v2559_v8 = vrot.slane %v2558_v5, 1  ;;  %v2618_v9 = vadd.f32 %v2617_v7, %v2616_v4 }
 0x1a0   : > { %v2560_v10 = vadd.f32 %v2559_v8, %v2558_v5  ;;  %v2619_v11 = vrot.slane %v2618_v9, 1 }
 0x1a2   : > { %2561 = vst [vmem:[%s204_s26] sm:$0x1] %v2560_v10  ;;  %v2620_v12 = vadd.f32 %v2619_v11, %v2618_v9 }
 0x1a4   : > { %2621 = vst [vmem:[%s204_s26 + $0x1] sm:$0x1] %v2620_v12 }
 0x1a5 PF: > { %s13_s16 = sadd.s32 1, %s3553_s16   ;;  %s4144_s12 = smov %s3545_s14 }
 0x1a6   : > { %p10_p7 = scmp.ge.s32.totalorder %s13_s16, 6   ;;  %s4145_s13 = smov %s3549_s15 }
 0x1a7   : > { %s4146_s14 = smov %s4149_s17  ;;  %s4147_s15 = smov %s4153_s18 }
 0x1a8   :  { %12 = sbr.rel (!%p10_p7) target bundleno = 3 (0x3), region = 62 }

</bundles_post_ra>
